<compile_context>
chip_gen: v5e
topology: v5e:2x2
jax: 0.10.0
libtpu: 0.0.40
codegen_flags: <defaults>
</compile_context>

<pallas_src>
import functools

import numpy as np
import jax
import jax.numpy as jnp
from jax.experimental import pallas as pl
from jax.experimental.pallas import tpu as pltpu

# ----- module hyper-parameters (defaults of Conv1dMultiscaleLocalization) -----
KERNEL_SIZES = [3, 9, 15, 21, 31, 51, 65]
NK = len(KERNEL_SIZES)
KMAX = max(KERNEL_SIZES)          # 65
PAD = KMAX // 2                   # 32
MIN_DIST = 5                      # local_max_min_dist
LOCAL_MAX_THR = 0.5               # local_max_thr
EXCLUDE_BORDER = 5                # exclude_border_px
LANE = 128                        # TPU lane width


def _generate_kernel(w):
    # replicates Conv1dMultiscaleLocalization._generate_kernel
    x = (w - 1) // 2
    k = -np.ones(w, dtype=np.float64)
    k[:x] = 1.0
    k[x] = 0.0
    return k / (w - 1)


@functools.lru_cache(maxsize=8)
def _make_constants(H, W, W_pad):
    """Deterministic parameters, cached per (H, W):
       - stacked banded matrices so the 1-D convs are single MXU matmuls,
       - the border/valid mask (also masks the W-padding lanes)."""
    taps = np.stack(
        [np.pad(_generate_kernel(ks), (KMAX - ks) // 2) for ks in KERNEL_SIZES]
    ).astype(np.float32)                                   # (NK, KMAX)

    # vertical band, all scales stacked along rows: (NK*H, H+2P)
    wcos = np.zeros((NK, H, H + 2 * PAD), np.float32)
    for k in range(NK):
        for h in range(H):
            wcos[k, h, h:h + KMAX] = taps[k]
    wcos = wcos.reshape(NK * H, H + 2 * PAD)

    # horizontal band, all scales stacked along columns: (W_pad+2P, NK*W_pad)
    wsin = np.zeros((NK, W_pad, W_pad + 2 * PAD), np.float32)
    for k in range(NK):
        for w in range(W_pad):
            wsin[k, w, w:w + KMAX] = taps[k]
    wsin = np.transpose(wsin, (2, 0, 1)).reshape(W_pad + 2 * PAD, NK * W_pad)

    # interior mask: excludes the border AND the padded lanes [W, W_pad)
    valid = np.zeros((H, W_pad), np.float32)
    valid[EXCLUDE_BORDER:H - EXCLUDE_BORDER, EXCLUDE_BORDER:W - EXCLUDE_BORDER] = 1.0

    return jnp.asarray(wcos), jnp.asarray(wsin), jnp.asarray(valid)


def _window_max(x, axis, size):
    """Running max over a centered window of `size` using log-doubling rolls.
    Wrap-around only corrupts the (size//2)-wide border, which is excluded."""
    n = x.shape[axis]
    cur = 1
    w = x
    while cur * 2 <= size:
        w = jnp.maximum(w, pltpu.roll(w, shift=(-cur) % n, axis=axis))
        cur *= 2
    if cur < size:
        w = jnp.maximum(w, pltpu.roll(w, shift=(-(size - cur)) % n, axis=axis))
    # center:  out[i] = max(x[i - size//2 .. i + size//2])
    return pltpu.roll(w, shift=(size - 1) // 2, axis=axis)


def _loc_kernel(wcos_ref, wsin_ref, valid_ref, cpad_ref, spad_ref,
                resp_ref, peak_ref, *, H, W_pad):
    cpad = cpad_ref[0]        # (H+2P, W_pad)   C zero-padded along H (and lanes)
    spad = spad_ref[0]        # (H, W_pad+2P)   S zero-padded along W

    # --- multiscale conv responses: TWO fused MXU matmuls -------------------
    vc = jnp.dot(wcos_ref[...], cpad, preferred_element_type=jnp.float32)  # (NK*H, W_pad)
    hc = jnp.dot(spad, wsin_ref[...], preferred_element_type=jnp.float32)  # (H, NK*W_pad)

    # max over the 7 scales of (vertical + horizontal); slices are aligned:
    # vc sublane slices at multiples of H, hc lane slices at multiples of 128.
    resp = vc[0:H, :] + hc[:, 0:W_pad]
    for k in range(1, NK):
        resp = jnp.maximum(
            resp, vc[k * H:(k + 1) * H, :] + hc[:, k * W_pad:(k + 1) * W_pad])
    resp_relu = jnp.maximum(resp, 0.0)                    # F.relu(conv_resp)

    # --- 11x11 stride-1 max pool (separable, log-doubling rolls) ------------
    size = 2 * MIN_DIST + 1
    mp = _window_max(_window_max(resp_relu, 0, size), 1, size)

    # --- peak mask: local max AND > threshold AND inside border/valid lanes -
    peak = ((resp_relu == mp)
            & (resp_relu > LOCAL_MAX_THR)
            & (valid_ref[...] > 0.5))

    resp_ref[0] = resp_relu
    peak_ref[0] = peak.astype(jnp.int8)


def conv1d_multiscale_localization(C, S, R=None, M=None, mask=None):
    """Equivalent of Conv1dMultiscaleLocalization.forward(C_, S_, R_, M_, mask_).

    C, S, mask: (B, 1, H, W) float32.  R, M are accepted and ignored (as in the
    PyTorch forward).  Returns (res, conv_resp_out) where res is (N, 5) rows of
    (b, x, y, mask_value, peak_value) and conv_resp_out is the ReLU'd
    multiscale response of shape (B, 1, H, W).
    """
    B, _, H, W = C.shape
    # the roll-based pool relies on border exclusion covering the wrap region
    assert EXCLUDE_BORDER >= MIN_DIST
    W_pad = max(LANE, ((W + LANE - 1) // LANE) * LANE)    # lane-dense width

    wcos, wsin, valid = _make_constants(H, W, W_pad)

    # zero-padding for the "same" conv + lane padding (glue, cheap)
    cpad = jnp.pad(C[:, 0], ((0, 0), (PAD, PAD), (0, W_pad - W)))        # (B, H+2P, Wp)
    spad = jnp.pad(S[:, 0], ((0, 0), (0, 0), (PAD, PAD + W_pad - W)))    # (B, H, Wp+2P)

    kernel = functools.partial(_loc_kernel, H=H, W_pad=W_pad)
    resp, peak = pl.pallas_call(
        kernel,
        out_shape=(jax.ShapeDtypeStruct((B, H, W_pad), jnp.float32),
                   jax.ShapeDtypeStruct((B, H, W_pad), jnp.int8)),
        grid_spec=pltpu.PrefetchScalarGridSpec(
            num_scalar_prefetch=0,
            grid=(B,),
            in_specs=[
                pl.BlockSpec((NK * H, H + 2 * PAD), lambda b: (0, 0)),
                pl.BlockSpec((W_pad + 2 * PAD, NK * W_pad), lambda b: (0, 0)),
                pl.BlockSpec((H, W_pad), lambda b: (0, 0)),
                pl.BlockSpec((1, H + 2 * PAD, W_pad), lambda b: (b, 0, 0)),
                pl.BlockSpec((1, H, W_pad + 2 * PAD), lambda b: (b, 0, 0)),
            ],
            out_specs=[
                pl.BlockSpec((1, H, W_pad), lambda b: (b, 0, 0)),
                pl.BlockSpec((1, H, W_pad), lambda b: (b, 0, 0)),
            ],
        ),
        compiler_params=pltpu.CompilerParams(
            dimension_semantics=("parallel",),
            vmem_limit_bytes=32 * 1024 * 1024),
    )(wcos, wsin, valid, cpad, spad)

    conv_resp_out = resp[:, :, :W][:, None, :, :]          # (B, 1, H, W)

    # TODO(synk): torch.nonzero produces a data-dependent shape; the count
    # forces one host sync here, but the value gathers stay on device.
    b_idx, y_idx, x_idx = jnp.nonzero(peak[:, :, :W] > 0)
    c_vals = resp[b_idx, y_idx, x_idx]
    m_vals = (mask[b_idx, 0, y_idx, x_idx] if mask is not None
              else jnp.zeros_like(c_vals))
    res = jnp.stack([b_idx.astype(jnp.float32),
                     x_idx.astype(jnp.float32),
                     y_idx.astype(jnp.float32),
                     m_vals.astype(jnp.float32),
                     c_vals.astype(jnp.float32)], axis=1)  # (N, 5): b, x, y, mask, value
    return res, conv_resp_out


if __name__ == "__main__":
    B, H, W = 2, 32, 32
    key = jax.random.PRNGKey(0)
    kc, ks, km = jax.random.split(key, 3)
    C_ = jax.random.normal(kc, (B, 1, H, W), jnp.float32)
    S_ = jax.random.normal(ks, (B, 1, H, W), jnp.float32)
    mask_ = jax.random.uniform(km, (B, 1, H, W), jnp.float32)
    # R_ and M_ are accepted by the PyTorch forward but never used.

    res, conv_resp_out = conv1d_multiscale_localization(C_, S_, None, None, mask_)
    jax.block_until_ready((res, conv_resp_out))
    print("KERNEL_OK")
</pallas_src>

<mosaic_0001>
module attributes {stable_mosaic.version = 11 : i64} {
  func.func @_loc_kernel(%arg0: i32, %arg1: memref<224x96xf32, #tpu.memory_space<vmem>>, %arg2: memref<192x896xf32, #tpu.memory_space<vmem>>, %arg3: memref<32x128xf32, #tpu.memory_space<vmem>>, %arg4: memref<1x96x128xf32, #tpu.memory_space<vmem>>, %arg5: memref<1x32x192xf32, #tpu.memory_space<vmem>>, %arg6: memref<1x32x128xf32, #tpu.memory_space<vmem>>, %arg7: memref<1x32x128xi8, #tpu.memory_space<vmem>>) attributes {dimension_semantics = [#tpu.dimension_semantics<parallel>], iteration_bounds = array<i64: 2>, scalar_prefetch = 0 : i64, scratch_operands = 0 : i64, tpu.core_type = #tpu.core_type<tc>, window_params = [{pipeline_mode = #tpu.pipeline_mode<synchronous>, transform_indices = @transform_0, window_bounds = array<i64: 224, 96>}, {pipeline_mode = #tpu.pipeline_mode<synchronous>, transform_indices = @transform_1, window_bounds = array<i64: 192, 896>}, {pipeline_mode = #tpu.pipeline_mode<synchronous>, transform_indices = @transform_2, window_bounds = array<i64: 32, 128>}, {transform_indices = @transform_3, window_bounds = array<i64: 1, 96, 128>}, {transform_indices = @transform_4, window_bounds = array<i64: 1, 32, 192>}, {transform_indices = @transform_5, window_bounds = array<i64: 1, 32, 128>}, {transform_indices = @transform_6, window_bounds = array<i64: 1, 32, 128>}]} {
    %c0 = arith.constant 0 : index
    %c0_0 = arith.constant 0 : index
    %c0_1 = arith.constant 0 : index
    %0 = vector.load %arg4[%c0, %c0_0, %c0_1] : memref<1x96x128xf32, #tpu.memory_space<vmem>>, vector<1x96x128xf32>
    %1 = vector.shape_cast %0 : vector<1x96x128xf32> to vector<96x128xf32>
    %c0_2 = arith.constant 0 : index
    %c0_3 = arith.constant 0 : index
    %c0_4 = arith.constant 0 : index
    %2 = vector.load %arg5[%c0_2, %c0_3, %c0_4] : memref<1x32x192xf32, #tpu.memory_space<vmem>>, vector<1x32x192xf32>
    %3 = vector.shape_cast %2 : vector<1x32x192xf32> to vector<32x192xf32>
    %c0_5 = arith.constant 0 : index
    %c0_6 = arith.constant 0 : index
    %4 = vector.load %arg1[%c0_5, %c0_6] : memref<224x96xf32, #tpu.memory_space<vmem>>, vector<224x96xf32>
    %cst = arith.constant dense<0.000000e+00> : vector<224x128xf32>
    %5 = tpu.matmul %4, %1, %cst {dimension_numbers = #tpu.dot_dimension_numbers<[1], [0], [0], [1], [0, 0, 1, 1], [], []>} : vector<224x96xf32>, vector<96x128xf32>, vector<224x128xf32> -> vector<224x128xf32>
    %c0_7 = arith.constant 0 : index
    %c0_8 = arith.constant 0 : index
    %6 = vector.load %arg2[%c0_7, %c0_8] : memref<192x896xf32, #tpu.memory_space<vmem>>, vector<192x896xf32>
    %cst_9 = arith.constant dense<0.000000e+00> : vector<32x896xf32>
    %7 = tpu.matmul %3, %6, %cst_9 {dimension_numbers = #tpu.dot_dimension_numbers<[1], [0], [0], [1], [0, 0, 1, 1], [], []>} : vector<32x192xf32>, vector<192x896xf32>, vector<32x896xf32> -> vector<32x896xf32>
    %8 = vector.extract_strided_slice %5 {offsets = [0, 0], sizes = [32, 128], strides = [1, 1]} : vector<224x128xf32> to vector<32x128xf32>
    %9 = vector.extract_strided_slice %7 {offsets = [0, 0], sizes = [32, 128], strides = [1, 1]} : vector<32x896xf32> to vector<32x128xf32>
    %10 = arith.addf %8, %9 : vector<32x128xf32>
    %11 = vector.extract_strided_slice %5 {offsets = [32, 0], sizes = [32, 128], strides = [1, 1]} : vector<224x128xf32> to vector<32x128xf32>
    %12 = vector.extract_strided_slice %7 {offsets = [0, 128], sizes = [32, 128], strides = [1, 1]} : vector<32x896xf32> to vector<32x128xf32>
    %13 = arith.addf %11, %12 : vector<32x128xf32>
    %14 = arith.maximumf %10, %13 : vector<32x128xf32>
    %15 = vector.extract_strided_slice %5 {offsets = [64, 0], sizes = [32, 128], strides = [1, 1]} : vector<224x128xf32> to vector<32x128xf32>
    %16 = vector.extract_strided_slice %7 {offsets = [0, 256], sizes = [32, 128], strides = [1, 1]} : vector<32x896xf32> to vector<32x128xf32>
    %17 = arith.addf %15, %16 : vector<32x128xf32>
    %18 = arith.maximumf %14, %17 : vector<32x128xf32>
    %19 = vector.extract_strided_slice %5 {offsets = [96, 0], sizes = [32, 128], strides = [1, 1]} : vector<224x128xf32> to vector<32x128xf32>
    %20 = vector.extract_strided_slice %7 {offsets = [0, 384], sizes = [32, 128], strides = [1, 1]} : vector<32x896xf32> to vector<32x128xf32>
    %21 = arith.addf %19, %20 : vector<32x128xf32>
    %22 = arith.maximumf %18, %21 : vector<32x128xf32>
    %23 = vector.extract_strided_slice %5 {offsets = [128, 0], sizes = [32, 128], strides = [1, 1]} : vector<224x128xf32> to vector<32x128xf32>
    %24 = vector.extract_strided_slice %7 {offsets = [0, 512], sizes = [32, 128], strides = [1, 1]} : vector<32x896xf32> to vector<32x128xf32>
    %25 = arith.addf %23, %24 : vector<32x128xf32>
    %26 = arith.maximumf %22, %25 : vector<32x128xf32>
    %27 = vector.extract_strided_slice %5 {offsets = [160, 0], sizes = [32, 128], strides = [1, 1]} : vector<224x128xf32> to vector<32x128xf32>
    %28 = vector.extract_strided_slice %7 {offsets = [0, 640], sizes = [32, 128], strides = [1, 1]} : vector<32x896xf32> to vector<32x128xf32>
    %29 = arith.addf %27, %28 : vector<32x128xf32>
    %30 = arith.maximumf %26, %29 : vector<32x128xf32>
    %31 = vector.extract_strided_slice %5 {offsets = [192, 0], sizes = [32, 128], strides = [1, 1]} : vector<224x128xf32> to vector<32x128xf32>
    %32 = vector.extract_strided_slice %7 {offsets = [0, 768], sizes = [32, 128], strides = [1, 1]} : vector<32x896xf32> to vector<32x128xf32>
    %33 = arith.addf %31, %32 : vector<32x128xf32>
    %34 = arith.maximumf %30, %33 : vector<32x128xf32>
    %cst_10 = arith.constant 0.000000e+00 : f32
    %35 = vector.broadcast %cst_10 : f32 to vector<32x128xf32>
    %36 = arith.maximumf %34, %35 : vector<32x128xf32>
    %c31_i32 = arith.constant 31 : i32
    %37 = tpu.dynamic_rotate %36 by %c31_i32 dim 0 : vector<32x128xf32>, i32 -> vector<32x128xf32>
    %38 = arith.maximumf %36, %37 : vector<32x128xf32>
    %c30_i32 = arith.constant 30 : i32
    %39 = tpu.dynamic_rotate %38 by %c30_i32 dim 0 : vector<32x128xf32>, i32 -> vector<32x128xf32>
    %40 = arith.maximumf %38, %39 : vector<32x128xf32>
    %c28_i32 = arith.constant 28 : i32
    %41 = tpu.dynamic_rotate %40 by %c28_i32 dim 0 : vector<32x128xf32>, i32 -> vector<32x128xf32>
    %42 = arith.maximumf %40, %41 : vector<32x128xf32>
    %c29_i32 = arith.constant 29 : i32
    %43 = tpu.dynamic_rotate %42 by %c29_i32 dim 0 : vector<32x128xf32>, i32 -> vector<32x128xf32>
    %44 = arith.maximumf %42, %43 : vector<32x128xf32>
    %c5_i32 = arith.constant 5 : i32
    %45 = tpu.dynamic_rotate %44 by %c5_i32 dim 0 : vector<32x128xf32>, i32 -> vector<32x128xf32>
    %c127_i32 = arith.constant 127 : i32
    %46 = tpu.dynamic_rotate %45 by %c127_i32 dim 1 : vector<32x128xf32>, i32 -> vector<32x128xf32>
    %47 = arith.maximumf %45, %46 : vector<32x128xf32>
    %c126_i32 = arith.constant 126 : i32
    %48 = tpu.dynamic_rotate %47 by %c126_i32 dim 1 : vector<32x128xf32>, i32 -> vector<32x128xf32>
    %49 = arith.maximumf %47, %48 : vector<32x128xf32>
    %c124_i32 = arith.constant 124 : i32
    %50 = tpu.dynamic_rotate %49 by %c124_i32 dim 1 : vector<32x128xf32>, i32 -> vector<32x128xf32>
    %51 = arith.maximumf %49, %50 : vector<32x128xf32>
    %c125_i32 = arith.constant 125 : i32
    %52 = tpu.dynamic_rotate %51 by %c125_i32 dim 1 : vector<32x128xf32>, i32 -> vector<32x128xf32>
    %53 = arith.maximumf %51, %52 : vector<32x128xf32>
    %c5_i32_11 = arith.constant 5 : i32
    %54 = tpu.dynamic_rotate %53 by %c5_i32_11 dim 1 : vector<32x128xf32>, i32 -> vector<32x128xf32>
    %55 = arith.cmpf oeq, %36, %54 : vector<32x128xf32>
    %cst_12 = arith.constant 5.000000e-01 : f32
    %56 = vector.broadcast %cst_12 : f32 to vector<32x128xf32>
    %57 = arith.cmpf ogt, %36, %56 : vector<32x128xf32>
    %58 = arith.andi %55, %57 : vector<32x128xi1>
    %c0_13 = arith.constant 0 : index
    %c0_14 = arith.constant 0 : index
    %59 = vector.load %arg3[%c0_13, %c0_14] : memref<32x128xf32, #tpu.memory_space<vmem>>, vector<32x128xf32>
    %cst_15 = arith.constant 5.000000e-01 : f32
    %60 = vector.broadcast %cst_15 : f32 to vector<32x128xf32>
    %61 = arith.cmpf ogt, %59, %60 : vector<32x128xf32>
    %62 = arith.andi %58, %61 : vector<32x128xi1>
    %c0_16 = arith.constant 0 : index
    %c0_17 = arith.constant 0 : index
    %c0_18 = arith.constant 0 : index
    %63 = vector.load %arg6[%c0_16, %c0_17, %c0_18] : memref<1x32x128xf32, #tpu.memory_space<vmem>>, vector<1x32x128xf32>
    %64 = vector.shape_cast %63 : vector<1x32x128xf32> to vector<32x128xf32>
    %65 = vector.shape_cast %36 : vector<32x128xf32> to vector<1x32x128xf32>
    tpu.vector_store %arg6[%c0_16, %c0_17, %c0_18], %65 {strides = array<i32>} : memref<1x32x128xf32, #tpu.memory_space<vmem>>, vector<1x32x128xf32>,
    %66 = arith.extui %62 : vector<32x128xi1> to vector<32x128xi8>
    %c0_19 = arith.constant 0 : index
    %c0_20 = arith.constant 0 : index
    %c0_21 = arith.constant 0 : index
    %67 = vector.load %arg7[%c0_19, %c0_20, %c0_21] : memref<1x32x128xi8, #tpu.memory_space<vmem>>, vector<1x32x128xi8>
    %68 = vector.shape_cast %67 : vector<1x32x128xi8> to vector<32x128xi8>
    %69 = vector.shape_cast %66 : vector<32x128xi8> to vector<1x32x128xi8>
    tpu.vector_store %arg7[%c0_19, %c0_20, %c0_21], %69 {strides = array<i32>} : memref<1x32x128xi8, #tpu.memory_space<vmem>>, vector<1x32x128xi8>,
    return
  }
  func.func @transform_0(%arg0: i32) -> (i32, i32) {
    %c0_i32 = arith.constant 0 : i32
    %c0_i32_0 = arith.constant 0 : i32
    %c0_i32_1 = arith.constant 0 : i32
    return %c0_i32, %c0_i32_0 : i32, i32
  }
  func.func @transform_1(%arg0: i32) -> (i32, i32) {
    %c0_i32 = arith.constant 0 : i32
    %c0_i32_0 = arith.constant 0 : i32
    %c0_i32_1 = arith.constant 0 : i32
    return %c0_i32, %c0_i32_0 : i32, i32
  }
  func.func @transform_2(%arg0: i32) -> (i32, i32) {
    %c0_i32 = arith.constant 0 : i32
    %c0_i32_0 = arith.constant 0 : i32
    %c0_i32_1 = arith.constant 0 : i32
    return %c0_i32, %c0_i32_0 : i32, i32
  }
  func.func @transform_3(%arg0: i32) -> (i32, i32, i32) {
    %c0_i32 = arith.constant 0 : i32
    %c0_i32_0 = arith.constant 0 : i32
    %c0_i32_1 = arith.constant 0 : i32
    return %arg0, %c0_i32, %c0_i32_0 : i32, i32, i32
  }
  func.func @transform_4(%arg0: i32) -> (i32, i32, i32) {
    %c0_i32 = arith.constant 0 : i32
    %c0_i32_0 = arith.constant 0 : i32
    %c0_i32_1 = arith.constant 0 : i32
    return %arg0, %c0_i32, %c0_i32_0 : i32, i32, i32
  }
  func.func @transform_5(%arg0: i32) -> (i32, i32, i32) {
    %c0_i32 = arith.constant 0 : i32
    %c0_i32_0 = arith.constant 0 : i32
    %c0_i32_1 = arith.constant 0 : i32
    return %arg0, %c0_i32, %c0_i32_0 : i32, i32, i32
  }
  func.func @transform_6(%arg0: i32) -> (i32, i32, i32) {
    %c0_i32 = arith.constant 0 : i32
    %c0_i32_0 = arith.constant 0 : i32
    %c0_i32_1 = arith.constant 0 : i32
    return %arg0, %c0_i32, %c0_i32_0 : i32, i32, i32
  }
}

</mosaic_0001>

<bundles_post_ra>
// kernel: tpu_custom_call.1
= control target key start
LH: loop header
LB: loop body
LE: loop exit
PB: predicated region body
PF: predicated region fallthrough
CT: control target
= control target key end

     0   :  { %12 = vsyncpa [#allocation3], 0  ;;  %s2331_s0 = inlined_call_operand.vmem [shape: f32[224,96], index: 0, kind: input, shape index: {}]   ;;  %s2332_s1 = inlined_call_operand.hbm [shape: f32[192,896], index: 1, kind: input, shape index: {}]   ;;  %s2333_s2 = inlined_call_operand.vmem [shape: f32[32,128], index: 2, kind: input, shape index: {}]   ;;  %s2334_s3 = inlined_call_operand.vmem [shape: f32[2,96,128], index: 3, kind: input, shape index: {}]   ;;  %s2335_s4 = inlined_call_operand.vmem [shape: f32[2,32,192], index: 4, kind: input, shape index: {}]   ;;  %s2336_s5 = inlined_call_operand.hbm [shape: f32[2,32,128], index: 5, kind: output, shape index: {0}]   ;;  %s2337_s6 = inlined_call_operand.hbm [shape: s8[2,32,128], index: 6, kind: output, shape index: {1}]  }
   0x1   :  { %13 = vsyncpa [#allocation4], 0 }
   0x2   :  { %15 = vsyncpa [#allocation4 + $0x1], 0 }
   0x3   :  { %16 = vsyncpa [#allocation7], 0 }
   0x4   :  { %18 = vsyncpa [#allocation7 + $0x1], 0  ;;  %s1831_s21 = smov 0   ;;  %s1833_s22 = smov 0  }
   0x5   :  { %s1835_s23 = smov 0   ;;  %s1837_s24 = smov 0  }
   0x6 LB: > { %s1852_s25 = sadd.s32 4294967295, %s1783_s24   ;;  %s1485_s26 = sadd.s32 4294967294, %s1783_s24   ;;  %s1783_s24 = sphi %s1837_s24, %s2345_s24   ;;  %s1779_s23 = sphi %s1835_s23, %s2344_s23   ;;  %s1775_s22 = sphi %s1833_s22, %s2343_s22   ;;  %s1771_s21 = sphi %s1831_s21, %s2342_s21  }
   0x7   : > { %s1856_s27 = sadd.s32 1, %s1783_s24   ;;  %s146_s28 = sadd.s32 1, %s1779_s23 }
   0x8   : > { %s143_s29 = ssub.s32 %s1783_s24, %s1856_s27  ;;  %p156_p0 = scmp.ne.s32.totalorder %s1779_s23, %s1775_s22 }
   0x9   : > { %p144_p1 = scmp.eq.s32.totalorder %s143_s29, 0  ;;  %p157_p2 = scmp.eq.s32.totalorder %s1852_s25, 1 }
   0xa   : > { %p162_p3 = scmp.ne.s32.totalorder %s1775_s22, %s1771_s21  ;;  %p163_p4 = scmp.eq.s32.totalorder %s1485_s26, 1 }
   0xb   : > { %s1867_s30 = scalar_select %p144_p1, %s1779_s23, %s146_s28  }
   0xc   : > { %p1869_p5 = por %p157_p2, %p156_p0  ;;  %p1873_p6 = por %p163_p4, %p162_p3 }
   0xd   : > { %p1486_p7 = scmp.ge.s32.totalorder %s1783_s24, 1  ;;  %p196_p8 = scmp.lt.s32.totalorder %s1783_s24, 3 }
   0xe   : > { %p1609_p9 = scmp.eq.s32.totalorder %s1852_s25, 0  ;;  %s210_s11 = sshll.u32 %s2332_s1, 4  ;;  %s211_s11 = int_to_ptr.hbm [resolvable:$true] %s210_s11 }
   0xf   : > { %p197_p10 = pnand %p1486_p7, %p196_p8  ;;  %s1785_s12 = smov [#allocation2]  }
  0x10   : > { %s212_s13 = sshll.u32 %s1785_s12, 4  ;;  %s1786_s14 = smov 896   ;;  %s213_s13 = int_to_ptr.vmem [resolvable:$true] %s212_s13 }
  0x11   : > { %p1598_p11 = pneg %p197_p10  ;;  %s1787_s15 = smov 56  }
  0x12   : > { %247 = sbr.rel (%p197_p10) target bundleno = 961 (0x3c1), region = 40 }
  0x13   : > { %p1599_p12 = pnand %p1609_p9, %p1598_p11 }
  0x15   : > { %1601 = dma.hbm_to_vmem [thread:$0]  (!%p1599_p12), %s211_s11, 21504, %s213_s13, [#allocation3], %s1786_s14, %s1786_s14, %s1787_s15  }
  0x17   : > { %1758 = dma.done.wait (%p1609_p9), [#allocation3], 21504  }
  0x18   : > { %1760 = vsyncadd (%p1609_p9), [#allocation3], 4294945792  ;;  %p288_p13 = scmp.lt.s32.totalorder %s1852_s25, 1  ;;  %v639_v1 = vld [vmem:[#allocation2 + $0x348] sm:$0xff]  ;;  %v632_v4 = vld [vmem:[#allocation2 + $0x310] sm:$0xff]  ;;  %vm702_vm0 = vcmask 523264  }
  0x19   : > { %v695_v2 = vld [vmem:[#allocation2 + $0x508] sm:$0xff]  ;;  %v688_v5 = vld [vmem:[#allocation2 + $0x4d0] sm:$0xff]  ;;  %715 = vmatpush.msra.mxu1 %v639_v1  ;;  %v625_v7 = vld [vmem:[#allocation2 + $0x2d8] sm:$0xff]  ;;  %vm348_vm1 = vcmask 785408   ;;  %s1788_s10 = smov 127   ;;  %s1789_s11 = smov 126  }
  0x1a   : > { %s1891_s16 = scalar_select %p288_p13, %s1852_s25, 1  ;;  %752 = vmatpush.msra.mxu2 %v695_v2  ;;  %v681_v8 = vld [vmem:[#allocation2 + $0x498] sm:$0xff]  ;;  %v618_v10 = vld [vmem:[#allocation2 + $0x2a0] sm:$0xff]  ;;  %v611_v13 = vld [vmem:[#allocation2 + $0x268] sm:$0xff] }
  0x1b   : > { %716 = vmatpush.msra.mxu1 %v632_v4  ;;  %v674_v11 = vld [vmem:[#allocation2 + $0x460] sm:$0xff]  ;;  %v667_v14 = vld [vmem:[#allocation2 + $0x428] sm:$0xff]  ;;  %v604_v16 = vld [vmem:[#allocation2 + $0x230] sm:$0xff]  ;;  %s1790_s12 = smov 124   ;;  %s1791_s13 = smov 125  }
  0x1c   : > { %s1589_s17 = smul.u32 96, %s1891_s16  ;;  %753 = vmatpush.msra.mxu2 %v688_v5  ;;  %s1559_s26 = sshll.u32 %s1891_s16, 6  ;;  %v660_v17 = vld [vmem:[#allocation2 + $0x3f0] sm:$0xff]  ;;  %v597_v19 = vld [vmem:[#allocation2 + $0x1f8] sm:$0xff]  ;;  %v590_v22 = vld [vmem:[#allocation2 + $0x1c0] sm:$0xff] }
  0x1d   : > { %717 = vmatpush.msra.mxu1 %v625_v7  ;;  %v653_v20 = vld [vmem:[#allocation2 + $0x3b8] sm:$0xff]  ;;  %s1910_s9 = scalar_lea.vmem %s2335_s4, %s1559_s26  ;;  %v646_v23 = vld [vmem:[#allocation2 + $0x380] sm:$0xff]  ;;  %v583_v26 = vld [vmem:[#allocation2 + $0x188] sm:$0xff]  ;;  %s2180_s26 = sand.u32 1, %s1775_s22  }
  0x1e   : > { %s1897_s20 = scalar_lea.vmem %s2334_s3, %s1589_s17  ;;  %754 = vmatpush.msra.mxu2 %v681_v8  ;;  %v1914_v24 = vld [vmem:[%s1910_s9 + $0x8] sm:$0xff]  ;;  %v640_v27 = vld [vmem:[#allocation2 + $0x350] sm:$0xff]  ;;  %v633_v30 = vld [vmem:[#allocation2 + $0x318] sm:$0xff]  ;;  %s1491_s28 = sshll.u32 %s2180_s26, 5 }
  0x1f   : > { %v311_v0 = vld [vmem:[%s1897_s20 + $0x58] sm:$0xff]  ;;  %v310_v3 = vld [vmem:[%s1897_s20 + $0x50] sm:$0xff]  ;;  %v309_v6 = vld [vmem:[%s1897_s20 + $0x48] sm:$0xff]  ;;  %718 = vmatpush.msra.mxu1 %v618_v10  ;;  %s2191_s29 = scalar_lea.vmem [#allocation5], %s1491_s28  ;;  %s1792_s14 = smov 5  }
  0x20   : > { %437 = vmatpush.msra.mxu0 %v311_v0  ;;  %1561 = vmatpush.msra.mxu3 %v311_v0  ;;  %v308_v9 = vld [vmem:[%s1897_s20 + $0x40] sm:$0xff]  ;;  %v307_v12 = vld [vmem:[%s1897_s20 + $0x38] sm:$0xff]  ;;  %v306_v15 = vld [vmem:[%s1897_s20 + $0x30] sm:$0xff]  ;;  %s1560_s15 = sshll.u32 %s1852_s25, 5  ;;  %s1349_s18 = sshll.u32 %s2191_s29, 4  ;;  %s1350_s18 = int_to_ptr.vmem [resolvable:$true] %s1349_s18 }
  0x21   : > { %755 = vmatpush.msra.mxu2 %v674_v11  ;;  %719 = vmatpush.msra.mxu1 %v611_v13  ;;  %v305_v18 = vld [vmem:[%s1897_s20 + $0x28] sm:$0xff]  ;;  %v304_v21 = vld [vmem:[%s1897_s20 + $0x20] sm:$0xff]  ;;  %v303_v25 = vld [vmem:[%s1897_s20 + $0x18] sm:$0xff]  ;;  %s1348_s17 = scalar_lea.hbm %s2336_s5, %s1560_s15 }
  0x22   : > { %438 = vmatpush.msra.mxu0 %v310_v3  ;;  %1562 = vmatpush.msra.mxu3 %v310_v3  ;;  %v302_v28 = vld [vmem:[%s1897_s20 + $0x10] sm:$0xff]  ;;  %v301_v31 = vld [vmem:[%s1897_s20 + $0x8] sm:$0xff]  ;;  %v569_v32 = vld [vmem:[#allocation2 + $0x118] sm:$0xff]  ;;  %s1351_s19 = sshll.u32 %s1348_s17, 4  ;;  %s1352_s19 = int_to_ptr.hbm [resolvable:$true] %s1351_s19 }
  0x23   : > { %756 = vmatpush.msra.mxu2 %v667_v14  ;;  %720 = vmatpush.msra.mxu1 %v604_v16  ;;  %v576_v29 = vld [vmem:[#allocation2 + $0x150] sm:$0xff]  ;;  %v626_v33 = vld [vmem:[#allocation2 + $0x2e0] sm:$0xff]  ;;  %v619_v36 = vld [vmem:[#allocation2 + $0x2a8] sm:$0xff]  ;;  %s1699_s28 = sshra.s32 %s1352_s19, 4  ;;  %s1700_s28 = int_to_ptr.hbm [resolvable:$true] %s1699_s28 }
  0x24   : > { %439 = vmatpush.msra.mxu0 %v309_v6  ;;  %1563 = vmatpush.msra.mxu3 %v309_v6  ;;  %v300_v34 = vld [vmem:[%s1897_s20] sm:$0xff]  ;;  %v341_v38 = vld [vmem:[%s2331_s0 + $0xa8] sm:$0xff]  ;;  %v1929_v39 = vld [vmem:[%s1910_s9 + $0x18] sm:$0xff]  ;;  %s1332_s20 = scalar_lea.sflag [#allocation4], %s2180_s26  ;;  %p1706_p3 = scmp.lt.s32.totalorder %s1700_s28, %s2336_s5 }
  0x25   : > { %757 = vmatpush.msra.mxu2 %v660_v17  ;;  %721 = vmatpush.msra.mxu1 %v597_v19  ;;  %v562_v35 = vld [vmem:[#allocation2 + $0xe0] sm:$0xff]  ;;  %v555_v40 = vld [vmem:[#allocation2 + $0xa8] sm:$0xff]  ;;  %v612_v41 = vld [vmem:[#allocation2 + $0x270] sm:$0xff] }
  0x26   : > { %440 = vmatpush.msra.mxu0 %v308_v9  ;;  %1564 = vmatpush.msra.mxu3 %v308_v9  ;;  %v320_v37 = vld [vmem:[%s2331_s0] sm:$0xff]  ;;  %v548_v42 = vld [vmem:[#allocation2 + $0x70] sm:$0xff]  ;;  %v605_v43 = vld [vmem:[#allocation2 + $0x238] sm:$0xff] }
  0x27   : > { %758 = vmatpush.msra.mxu2 %v653_v20  ;;  %722 = vmatpush.msra.mxu1 %v590_v22  ;;  %v541_v44 = vld [vmem:[#allocation2 + $0x38] sm:$0xff]  ;;  %v598_v45 = vld [vmem:[#allocation2 + $0x200] sm:$0xff]  ;;  %v321_v47 = vld [vmem:[%s2331_s0 + $0x8] sm:$0xff] }
  0x28   : > { %441 = vmatpush.msra.mxu0 %v307_v12  ;;  %1565 = vmatpush.msra.mxu3 %v307_v12  ;;  %v534_v46 = vld [vmem:[#allocation2] sm:$0xff]  ;;  %v591_v48 = vld [vmem:[#allocation2 + $0x1c8] sm:$0xff]  ;;  %v342_v49 = vld [vmem:[%s2331_s0 + $0xb0] sm:$0xff] }
  0x29   : > { %759 = vmatpush.msra.mxu2 %v646_v23  ;;  %723 = vmatpush.msra.mxu1 %v583_v26  ;;  %v1942_v50 = vld [vmem:[%s1910_s9] sm:$0xff]  ;;  %v1945_v51 = vld [vmem:[%s1910_s9 + $0x28] sm:$0xff]  ;;  %v584_v52 = vld [vmem:[#allocation2 + $0x190] sm:$0xff] }
  0x2a   : > { %442 = vmatpush.msra.mxu0 %v306_v15  ;;  %1566 = vmatpush.msra.mxu3 %v306_v15  ;;  %v641_v53 = vld [vmem:[#allocation2 + $0x358] sm:$0xff]  ;;  %v634_v55 = vld [vmem:[#allocation2 + $0x320] sm:$0xff]  ;;  %v322_v57 = vld [vmem:[%s2331_s0 + $0x10] sm:$0xff] }
  0x2b   : > { %1524 = vmatmul.msk.f32.vlgmr.msra.gmra.mxu2 %vm702_vm0, %v1914_v24  ;;  %724 = vmatpush.msra.mxu1 %v576_v29  ;;  %v577_v54 = vld [vmem:[#allocation2 + $0x158] sm:$0xff]  ;;  %v570_v56 = vld [vmem:[#allocation2 + $0x120] sm:$0xff]  ;;  %v627_v58 = vld [vmem:[#allocation2 + $0x2e8] sm:$0xff] }
  0x2c   : > { %443 = vmatpush.msra.mxu0 %v305_v18  ;;  %1567 = vmatpush.msra.mxu3 %v305_v18  ;;  %v563_v59 = vld [vmem:[#allocation2 + $0xe8] sm:$0xff]  ;;  %v343_v60 = vld [vmem:[%s2331_s0 + $0xb8] sm:$0xff]  ;;  %v1959_v61 = vld [vmem:[%s1910_s9 + $0x10] sm:$0xff] }
  0x2d   : > { %773 = vmatpush.msrb.mxu2 %v640_v27  ;;  %725 = vmatpush.msra.mxu1 %v569_v32  ;;  %v1962_v62 = vld [vmem:[%s1910_s9 + $0x38] sm:$0xff]  ;;  %v556_v63 = vld [vmem:[#allocation2 + $0xb0] sm:$0xff]  ;;  %v542_v3 = vld [vmem:[#allocation2 + $0x40] sm:$0xff] }
  0x2e   : > { %444 = vmatpush.msra.mxu0 %v304_v21  ;;  %1568 = vmatpush.msra.mxu3 %v304_v21  ;;  %v620_v0 = vld [vmem:[#allocation2 + $0x2b0] sm:$0xff]  ;;  %v549_v1 = vld [vmem:[#allocation2 + $0x78] sm:$0xff]  ;;  %v606_v5 = vld [vmem:[#allocation2 + $0x240] sm:$0xff] }
  0x2f   : > { %774 = vmatpush.msrb.mxu2 %v633_v30  ;;  %726 = vmatpush.msra.mxu1 %v562_v35  ;;  %v613_v2 = vld [vmem:[#allocation2 + $0x278] sm:$0xff]  ;;  %v1972_v6 = vld [vmem:[#allocation2 + $0x8] sm:$0xff]  ;;  %v344_v7 = vld [vmem:[%s2331_s0 + $0xc0] sm:$0xff] }
  0x30   : > { %445 = vmatpush.msra.mxu0 %v303_v25  ;;  %1569 = vmatpush.msra.mxu3 %v303_v25  ;;  %v323_v4 = vld [vmem:[%s2331_s0 + $0x18] sm:$0xff]  ;;  %v1978_v8 = vld [vmem:[%s1910_s9 + $0x20] sm:$0xff]  ;;  %v696_v9 = vld [vmem:[#allocation2 + $0x510] sm:$0xff] }
  0x31   : > { %775 = vmatpush.msrb.mxu2 %v626_v33  ;;  %727 = vmatpush.msra.mxu1 %v555_v40  ;;  %v599_v10 = vld [vmem:[#allocation2 + $0x208] sm:$0xff]  ;;  %v689_v11 = vld [vmem:[#allocation2 + $0x4d8] sm:$0xff]  ;;  %v592_v12 = vld [vmem:[#allocation2 + $0x1d0] sm:$0xff] }
  0x32   : > { %446 = vmatpush.msra.mxu0 %v302_v28  ;;  %1570 = vmatpush.msra.mxu3 %v302_v28  ;;  %v682_v13 = vld [vmem:[#allocation2 + $0x4a0] sm:$0xff]  ;;  %v585_v14 = vld [vmem:[#allocation2 + $0x198] sm:$0xff]  ;;  %v675_v16 = vld [vmem:[#allocation2 + $0x468] sm:$0xff] }
  0x33   : > { %776 = vmatpush.msrb.mxu2 %v619_v36  ;;  %728 = vmatpush.msra.mxu1 %v548_v42  ;;  %v324_v15 = vld [vmem:[%s2331_s0 + $0x20] sm:$0xff]  ;;  %v345_v17 = vld [vmem:[%s2331_s0 + $0xc8] sm:$0xff]  ;;  %v1992_v18 = vld [vmem:[%s1910_s9 + $0x30] sm:$0xff] }
  0x34   : > { %447 = vmatpush.msra.mxu0 %v301_v31  ;;  %1571 = vmatpush.msra.mxu3 %v301_v31  ;;  %v668_v19 = vld [vmem:[#allocation2 + $0x430] sm:$0xff]  ;;  %v578_v20 = vld [vmem:[#allocation2 + $0x160] sm:$0xff]  ;;  %v661_v21 = vld [vmem:[#allocation2 + $0x3f8] sm:$0xff] }
  0x35   : > { %1525 = vmatmul.msk.f32.gmra.mxu2 %vm702_vm0, %v1929_v39  ;;  %729 = vmatpush.msra.mxu1 %v541_v44  ;;  %v571_v22 = vld [vmem:[#allocation2 + $0x128] sm:$0xff]  ;;  %v654_v23 = vld [vmem:[#allocation2 + $0x3c0] sm:$0xff]  ;;  %v564_v25 = vld [vmem:[#allocation2 + $0xf0] sm:$0xff] }
  0x36   : > { %448 = vmatpush.msra.mxu0 %v300_v34  ;;  %1572 = vmatpush.msra.mxu3 %v300_v34  ;;  %v325_v26 = vld [vmem:[%s2331_s0 + $0x28] sm:$0xff]  ;;  %v557_v28 = vld [vmem:[#allocation2 + $0xb8] sm:$0xff]  ;;  %v346_v29 = vld [vmem:[%s2331_s0 + $0xd0] sm:$0xff] }
  0x37   : > { %1496 = vmatmul.msk.f32.vlgmr.msra.gmra.mxu0 %vm348_vm1, %v320_v37  ;;  %1517 = vmatmul.msk.f32.vlgmr.msra.gmra.mxu3 %vm348_vm1, %v341_v38  ;;  %v642_v31 = vld [vmem:[#allocation2 + $0x360] sm:$0xff]  ;;  %v543_v32 = vld [vmem:[#allocation2 + $0x48] sm:$0xff]  ;;  %v697_v34 = vld [vmem:[#allocation2 + $0x518] sm:$0xff] }
  0x38   : > { %1573 = vmatpush.msrb.mxu3 %v640_v27  ;;  %777 = vmatpush.msrb.mxu2 %v612_v41  ;;  %v647_v27 = vld [vmem:[#allocation2 + $0x388] sm:$0xff]  ;;  %v536_v35 = vld [vmem:[#allocation2 + $0x10] sm:$0xff]  ;;  %v621_v38 = vld [vmem:[#allocation2 + $0x2b8] sm:$0xff] }
  0x39   : > { %730 = vmatpush.msra.mxu1 %v534_v46  ;;  %v326_v37 = vld [vmem:[%s2331_s0 + $0x30] sm:$0xff]  ;;  %v698_v40 = vld [vmem:[#allocation2 + $0x520] sm:$0xff] }
  0x3a   : > { %1574 = vmatpush.msrb.mxu3 %v633_v30  ;;  %778 = vmatpush.msrb.mxu2 %v605_v43  ;;  %v550_v30 = vld [vmem:[#allocation2 + $0x80] sm:$0xff]  ;;  %v684_v46 = vld [vmem:[#allocation2 + $0x4b0] sm:$0xff] }
  0x3b   : > { %731 = vmatmul.f32.vlgmr.msra.gmra.mxu1 %v1942_v50  ;;  %v614_v42 = vld [vmem:[#allocation2 + $0x280] sm:$0xff] }
  0x3c   : > { %1575 = vmatpush.msrb.mxu3 %v626_v33  ;;  %779 = vmatpush.msrb.mxu2 %v598_v45  ;;  %v635_v33 = vld [vmem:[#allocation2 + $0x328] sm:$0xff]  ;;  %v690_v44 = vld [vmem:[#allocation2 + $0x4e0] sm:$0xff] }
  0x3d   : > { %1526 = vmatmul.msk.f32.gmra.mxu2 %vm702_vm0, %v1945_v51  ;;  %831 = vmatpush.msrb.mxu1 %v641_v53  ;;  %v593_v53 = vld [vmem:[#allocation2 + $0x1d8] sm:$0xff] }
  0x3e   : > { %780 = vmatpush.msrb.mxu2 %v591_v48  ;;  %1576 = vmatpush.msrb.mxu3 %v619_v36  ;;  %v628_v36 = vld [vmem:[#allocation2 + $0x2f0] sm:$0xff] }
  0x3f   : > { %1497 = vmatmul.msk.f32.gmra.mxu0 %vm348_vm1, %v321_v47  ;;  %1518 = vmatmul.msk.f32.gmra.mxu3 %vm348_vm1, %v342_v49  ;;  %v683_v47 = vld [vmem:[#allocation2 + $0x4a8] sm:$0xff]  ;;  %v677_v49 = vld [vmem:[#allocation2 + $0x478] sm:$0xff] }
  0x40   : > { %781 = vmatpush.msrb.mxu2 %v584_v52  ;;  %1577 = vmatpush.msrb.mxu3 %v612_v41  ;;  %v347_v41 = vld [vmem:[%s2331_s0 + $0xd8] sm:$0xff] }
  0x41   : > { %832 = vmatpush.msrb.mxu1 %v634_v55  ;;  %v586_v55 = vld [vmem:[#allocation2 + $0x1a0] sm:$0xff] }
  0x42   : > { %782 = vmatpush.msrb.mxu2 %v577_v54  ;;  %1578 = vmatpush.msrb.mxu3 %v605_v43  ;;  %v691_v43 = vld [vmem:[#allocation2 + $0x4e8] sm:$0xff] }
  0x43   : > { %833 = vmatpush.msrb.mxu1 %v627_v58  ;;  %v579_v58 = vld [vmem:[#allocation2 + $0x168] sm:$0xff] }
  0x44   : > { %783 = vmatpush.msrb.mxu2 %v570_v56  ;;  %734 = vmatmul.f32.gmra.mxu1 %v1959_v61 }
  0x45   : > { %1527 = vmatmul.msk.f32.gmra.mxu2 %vm702_vm0, %v1962_v62  ;;  %1579 = vmatpush.msrb.mxu3 %v598_v45  ;;  %v607_v45 = vld [vmem:[#allocation2 + $0x248] sm:$0xff] }
  0x46   : > { %784 = vmatpush.msrb.mxu2 %v563_v59  ;;  %834 = vmatpush.msrb.mxu1 %v620_v0  ;;  %v655_v0 = vld [vmem:[#allocation2 + $0x3c8] sm:$0xff] }
  0x47   : > { %1498 = vmatmul.msk.f32.gmra.mxu0 %vm348_vm1, %v322_v57  ;;  %1519 = vmatmul.msk.f32.gmra.mxu3 %vm348_vm1, %v343_v60  ;;  %v670_v57 = vld [vmem:[#allocation2 + $0x440] sm:$0xff]  ;;  %v663_v60 = vld [vmem:[#allocation2 + $0x408] sm:$0xff] }
  0x48   : > { %785 = vmatpush.msrb.mxu2 %v556_v63  ;;  %1580 = vmatpush.msrb.mxu3 %v591_v48  ;;  %v600_v48 = vld [vmem:[#allocation2 + $0x210] sm:$0xff] }
  0x49   : > { %835 = vmatpush.msrb.mxu1 %v613_v2  ;;  %v565_v2 = vld [vmem:[#allocation2 + $0xf8] sm:$0xff] }
  0x4a   : > { %786 = vmatpush.msrb.mxu2 %v549_v1  ;;  %1581 = vmatpush.msrb.mxu3 %v584_v52  ;;  %v327_v52 = vld [vmem:[%s2331_s0 + $0x38] sm:$0xff] }
  0x4b   : > { %836 = vmatpush.msrb.mxu1 %v606_v5  ;;  %v656_v5 = vld [vmem:[#allocation2 + $0x3d0] sm:$0xff] }
  0x4c   : > { %787 = vmatpush.msrb.mxu2 %v542_v3  ;;  %737 = vmatmul.f32.gmra.mxu1 %v1978_v8 }
  0x4d   : > { %837 = vmatpush.msrb.mxu1 %v599_v10  ;;  %1582 = vmatpush.msrb.mxu3 %v577_v54  ;;  %v676_v54 = vld [vmem:[#allocation2 + $0x470] sm:$0xff] }
  0x4e   : > { %788 = vmatpush.msrb.mxu2 %v1972_v6  ;;  %v636_v10 = vld [vmem:[#allocation2 + $0x330] sm:$0xff] }
  0x4f   : > { %1499 = vmatmul.msk.f32.gmra.mxu0 %vm348_vm1, %v323_v4  ;;  %1520 = vmatmul.msk.f32.gmra.mxu3 %vm348_vm1, %v344_v7  ;;  %v558_v4 = vld [vmem:[#allocation2 + $0xc0] sm:$0xff]  ;;  %v551_v7 = vld [vmem:[#allocation2 + $0x88] sm:$0xff] }
  0x50   : > { %789 = vmatmul.f32.vlgmr.msrb.gmra.mxu2 %v1942_v50  ;;  %838 = vmatpush.msrb.mxu1 %v592_v12  ;;  %v544_v12 = vld [vmem:[#allocation2 + $0x50] sm:$0xff] }
  0x51   : > { %810 = vmatpush.msra.mxu2 %v696_v9  ;;  %1583 = vmatpush.msrb.mxu3 %v570_v56  ;;  %v669_v56 = vld [vmem:[#allocation2 + $0x438] sm:$0xff] }
  0x52   : > { %839 = vmatpush.msrb.mxu1 %v585_v14  ;;  %v649_v9 = vld [vmem:[#allocation2 + $0x398] sm:$0xff] }
  0x53   : > { %811 = vmatpush.msra.mxu2 %v689_v11  ;;  %1584 = vmatpush.msrb.mxu3 %v563_v59  ;;  %v662_v59 = vld [vmem:[#allocation2 + $0x400] sm:$0xff]  ;;  %v644_v11 = vld [vmem:[#allocation2 + $0x370] sm:$0xff]  ;;  %v537_v14 = vld [vmem:[#allocation2 + $0x18] sm:$0xff] }
  0x54   : > { %740 = vmatmul.f32.gmra.mxu1 %v1992_v18 }
  0x55   : > { %812 = vmatpush.msra.mxu2 %v682_v13  ;;  %840 = vmatpush.msrb.mxu1 %v578_v20  ;;  %v329_v13 = vld [vmem:[%s2331_s0 + $0x48] sm:$0xff]  ;;  %v692_v20 = vld [vmem:[#allocation2 + $0x4f0] sm:$0xff] }
  0x56   : > { %1585 = vmatpush.msrb.mxu3 %v556_v63  ;;  %v572_v63 = vld [vmem:[#allocation2 + $0x130] sm:$0xff] }
  0x57   : > { %1500 = vmatmul.msk.f32.gmra.mxu0 %vm348_vm1, %v324_v15  ;;  %813 = vmatpush.msra.mxu2 %v675_v16  ;;  %v629_v15 = vld [vmem:[#allocation2 + $0x2f8] sm:$0xff]  ;;  %v699_v16 = vld [vmem:[#allocation2 + $0x528] sm:$0xff] }
  0x58   : > { %1521 = vmatmul.msk.f32.gmra.mxu3 %vm348_vm1, %v345_v17  ;;  %792 = vmatmul.f32.gmra.mxu2 %v1959_v61  ;;  %v622_v17 = vld [vmem:[#allocation2 + $0x2c0] sm:$0xff] }
  0x59   : > { %814 = vmatpush.msra.mxu2 %v668_v19  ;;  %841 = vmatpush.msrb.mxu1 %v571_v22  ;;  %v637_v19 = vld [vmem:[#allocation2 + $0x338] sm:$0xff]  ;;  %v630_v22 = vld [vmem:[#allocation2 + $0x300] sm:$0xff] }
  0x5a   : > { %1586 = vmatpush.msrb.mxu3 %v549_v1  ;;  %v328_v1 = vld [vmem:[%s2331_s0 + $0x40] sm:$0xff] }
  0x5b   : > { %815 = vmatpush.msra.mxu2 %v661_v21  ;;  %842 = vmatpush.msrb.mxu1 %v564_v25  ;;  %v615_v21 = vld [vmem:[#allocation2 + $0x288] sm:$0xff]  ;;  %v685_v25 = vld [vmem:[#allocation2 + $0x4b8] sm:$0xff] }
  0x5c   : > { %1587 = vmatpush.msrb.mxu3 %v542_v3  ;;  %v648_v3 = vld [vmem:[#allocation2 + $0x390] sm:$0xff] }
  0x5d   : > { %816 = vmatpush.msra.mxu2 %v654_v23  ;;  %843 = vmatpush.msrb.mxu1 %v557_v28  ;;  %v608_v23 = vld [vmem:[#allocation2 + $0x250] sm:$0xff]  ;;  %v623_v28 = vld [vmem:[#allocation2 + $0x2c8] sm:$0xff] }
  0x5e   : > { %1588 = vmatpush.msrb.mxu3 %v1972_v6  ;;  %v643_v6 = vld [vmem:[#allocation2 + $0x368] sm:$0xff] }
  0x5f   : > { %1501 = vmatmul.msk.f32.gmra.mxu0 %vm348_vm1, %v325_v26  ;;  %817 = vmatpush.msra.mxu2 %v647_v27  ;;  %v330_v26 = vld [vmem:[%s2331_s0 + $0x50] sm:$0xff]  ;;  %v601_v27 = vld [vmem:[#allocation2 + $0x218] sm:$0xff] }
  0x60   : > { %1522 = vmatmul.msk.f32.gmra.mxu3 %vm348_vm1, %v346_v29  ;;  %1528 = vmatmul.msk.f32.vlgmr.msra.gmra.mxu2 %vm702_vm0, %v1914_v24  ;;  %v594_v29 = vld [vmem:[#allocation2 + $0x1e0] sm:$0xff] }
  0x61   : > { %844 = vmatpush.msrb.mxu1 %v550_v30  ;;  %889 = vmatpush.msrb.mxu2 %v642_v31  ;;  %v678_v30 = vld [vmem:[#allocation2 + $0x480] sm:$0xff]  ;;  %v616_v31 = vld [vmem:[#allocation2 + $0x290] sm:$0xff] }
  0x62   : > { %868 = vmatpush.msra.mxu3 %v697_v34  ;;  %v609_v34 = vld [vmem:[#allocation2 + $0x258] sm:$0xff] }
  0x63   : > { %845 = vmatpush.msrb.mxu1 %v543_v32  ;;  %890 = vmatpush.msrb.mxu2 %v635_v33  ;;  %v587_v32 = vld [vmem:[#allocation2 + $0x1a8] sm:$0xff] }
  0x64   : > { %869 = vmatpush.msra.mxu3 %v690_v44  ;;  %v671_v33 = vld [vmem:[#allocation2 + $0x448] sm:$0xff]  ;;  %v588_v44 = vld [vmem:[#allocation2 + $0x1b0] sm:$0xff] }
  0x65   : > { %846 = vmatpush.msrb.mxu1 %v536_v35  ;;  %891 = vmatpush.msrb.mxu2 %v628_v36  ;;  %v580_v35 = vld [vmem:[#allocation2 + $0x170] sm:$0xff] }
  0x66   : > { %847 = vmatmul.f32.vlgmr.msrb.gmra.mxu1 %v1942_v50  ;;  %870 = vmatpush.msra.mxu3 %v683_v47  ;;  %v664_v36 = vld [vmem:[#allocation2 + $0x410] sm:$0xff]  ;;  %v581_v47 = vld [vmem:[#allocation2 + $0x178] sm:$0xff] }
  0x67   : > { %1502 = vmatmul.msk.f32.gmra.mxu0 %vm348_vm1, %v326_v37  ;;  %892 = vmatpush.msrb.mxu2 %v621_v38  ;;  %v331_v37 = vld [vmem:[%s2331_s0 + $0x58] sm:$0xff]  ;;  %v602_v38 = vld [vmem:[#allocation2 + $0x220] sm:$0xff] }
  0x68   : > { %926 = vmatpush.msra.mxu1 %v698_v40  ;;  %1523 = vmatmul.msk.f32.gmra.mxu3 %vm348_vm1, %v347_v41  ;;  %v573_v40 = vld [vmem:[#allocation2 + $0x138] sm:$0xff]  ;;  %v595_v41 = vld [vmem:[#allocation2 + $0x1e8] sm:$0xff] }
  0x69   : > { %1529 = vmatmul.msk.f32.gmra.mxu2 %vm702_vm0, %v1929_v39  ;;  %871 = vmatpush.msra.mxu3 %v676_v54  ;;  %v567_v54 = vld [vmem:[#allocation2 + $0x108] sm:$0xff] }
  0x6a   : > { %893 = vmatpush.msrb.mxu2 %v614_v42  ;;  %927 = vmatpush.msra.mxu1 %v691_v43  ;;  %v566_v42 = vld [vmem:[#allocation2 + $0x100] sm:$0xff]  ;;  %v657_v43 = vld [vmem:[#allocation2 + $0x3d8] sm:$0xff] }
  0x6b   : > { %872 = vmatpush.msra.mxu3 %v669_v56  ;;  %v700_v56 = vld [vmem:[#allocation2 + $0x530] sm:$0xff] }
  0x6c   : > { %894 = vmatpush.msrb.mxu2 %v607_v45  ;;  %928 = vmatpush.msra.mxu1 %v684_v46  ;;  %v559_v45 = vld [vmem:[#allocation2 + $0xc8] sm:$0xff]  ;;  %v650_v46 = vld [vmem:[#allocation2 + $0x3a0] sm:$0xff] }
  0x6d   : > { %873 = vmatpush.msra.mxu3 %v662_v59  ;;  %v638_v59 = vld [vmem:[#allocation2 + $0x340] sm:$0xff] }
  0x6e   : > { %895 = vmatpush.msrb.mxu2 %v600_v48  ;;  %929 = vmatpush.msra.mxu1 %v677_v49  ;;  %v552_v48 = vld [vmem:[#allocation2 + $0x90] sm:$0xff]  ;;  %v332_v49 = vld [vmem:[%s2331_s0 + $0x60] sm:$0xff] }
  0x6f   : > { %850 = vmatmul.f32.gmra.mxu1 %v1959_v61  ;;  %1503 = vmatmul.msk.f32.gmra.mxu0 %vm348_vm1, %v327_v52  ;;  %v574_v52 = vld [vmem:[#allocation2 + $0x140] sm:$0xff] }
  0x70   : > { %896 = vmatpush.msrb.mxu2 %v593_v53  ;;  %795 = vmatmul.f32.vlgmr.msrb.gmra.mxu3 %v1978_v8  ;;  %v545_v53 = vld [vmem:[#allocation2 + $0x58] sm:$0xff] }
  0x71   : > { %1530 = vmatmul.msk.f32.gmra.mxu2 %vm702_vm0, %v1945_v51  ;;  %930 = vmatpush.msra.mxu1 %v670_v57  ;;  %v645_v57 = vld [vmem:[#allocation2 + $0x378] sm:$0xff] }
  0x72   : > { %897 = vmatpush.msrb.mxu2 %v586_v55  ;;  %874 = vmatpush.msra.mxu3 %v655_v0  ;;  %v538_v55 = vld [vmem:[#allocation2 + $0x20] sm:$0xff]  ;;  %v333_v0 = vld [vmem:[%s2331_s0 + $0x68] sm:$0xff] }
  0x73   : > { %931 = vmatpush.msra.mxu1 %v663_v60  ;;  %v693_v60 = vld [vmem:[#allocation2 + $0x4f8] sm:$0xff] }
  0x74   : > { %898 = vmatpush.msrb.mxu2 %v579_v58  ;;  %875 = vmatpush.msra.mxu3 %v648_v3  ;;  %v560_v58 = vld [vmem:[#allocation2 + $0xd0] sm:$0xff]  ;;  %v539_v3 = vld [vmem:[#allocation2 + $0x28] sm:$0xff] }
  0x75   : > { %932 = vmatpush.msra.mxu1 %v656_v5  ;;  %v686_v5 = vld [vmem:[#allocation2 + $0x4c0] sm:$0xff] }
  0x76   : > { %899 = vmatpush.msrb.mxu2 %v572_v63  ;;  %947 = vmatpush.msrb.mxu3 %v643_v6  ;;  %v553_v63 = vld [vmem:[#allocation2 + $0x98] sm:$0xff] }
  0x77   : > { %853 = vmatmul.f32.gmra.mxu1 %v1978_v8  ;;  %1504 = vmatmul.msk.f32.gmra.mxu0 %vm348_vm1, %v328_v1  ;;  %v546_v1 = vld [vmem:[#allocation2 + $0x60] sm:$0xff]  ;;  %v701_v6 = vld [vmem:[#allocation2 + $0x538] sm:$0xff] }
  0x78   : > { %900 = vmatpush.msrb.mxu2 %v565_v2  ;;  %798 = vmatmul.f32.gmra.mxu3 %v1992_v18  ;;  %v631_v2 = vld [vmem:[#allocation2 + $0x308] sm:$0xff] }
  0x79   : > { %1531 = vmatmul.msk.f32.gmra.mxu2 %vm702_vm0, %v1962_v62  ;;  %933 = vmatpush.msra.mxu1 %v649_v9  ;;  %v679_v9 = vld [vmem:[#allocation2 + $0x488] sm:$0xff] }
  0x7a   : > { %901 = vmatpush.msrb.mxu2 %v558_v4  ;;  %948 = vmatpush.msrb.mxu3 %v636_v10  ;;  %v624_v4 = vld [vmem:[#allocation2 + $0x2d0] sm:$0xff]  ;;  %v694_v10 = vld [vmem:[#allocation2 + $0x500] sm:$0xff] }
  0x7b   : > { %1005 = vmatpush.msrb.mxu1 %v644_v11  ;;  %v610_v11 = vld [vmem:[#allocation2 + $0x260] sm:$0xff] }
  0x7c   : > { %902 = vmatpush.msrb.mxu2 %v551_v7  ;;  %949 = vmatpush.msrb.mxu3 %v629_v15  ;;  %v617_v7 = vld [vmem:[#allocation2 + $0x298] sm:$0xff]  ;;  %v596_v15 = vld [vmem:[#allocation2 + $0x1f0] sm:$0xff] }
  0x7d   : > { %1006 = vmatpush.msrb.mxu1 %v637_v19  ;;  %v589_v19 = vld [vmem:[#allocation2 + $0x1b8] sm:$0xff] }
  0x7e   : > { %903 = vmatpush.msrb.mxu2 %v544_v12  ;;  %950 = vmatpush.msrb.mxu3 %v622_v17  ;;  %v334_v12 = vld [vmem:[%s2331_s0 + $0x70] sm:$0xff]  ;;  %v665_v17 = vld [vmem:[#allocation2 + $0x418] sm:$0xff] }
  0x7f   : > { %856 = vmatmul.f32.gmra.mxu1 %v1992_v18  ;;  %1505 = vmatmul.msk.f32.gmra.mxu0 %vm348_vm1, %v329_v13  ;;  %v603_v13 = vld [vmem:[#allocation2 + $0x228] sm:$0xff] }
  0x80   : > { %904 = vmatpush.msrb.mxu2 %v537_v14  ;;  %1532 = vmatmul.msk.f32.vlgmr.msra.gmra.mxu3 %vm702_vm0, %v1914_v24  ;;  %v672_v14 = vld [vmem:[#allocation2 + $0x450] sm:$0xff] }
  0x81   : > { %905 = vmatmul.f32.vlgmr.msrb.gmra.mxu2 %v1942_v50  ;;  %951 = vmatpush.msrb.mxu3 %v615_v21  ;;  %v658_v21 = vld [vmem:[#allocation2 + $0x3e0] sm:$0xff] }
  0x82   : > { %984 = vmatpush.msra.mxu2 %v699_v16  ;;  %1007 = vmatpush.msrb.mxu1 %v630_v22  ;;  %v687_v16 = vld [vmem:[#allocation2 + $0x4c8] sm:$0xff]  ;;  %v582_v22 = vld [vmem:[#allocation2 + $0x180] sm:$0xff] }
  0x83   : > { %952 = vmatpush.msrb.mxu3 %v608_v23  ;;  %v673_v23 = vld [vmem:[#allocation2 + $0x458] sm:$0xff] }
  0x84   : > { %985 = vmatpush.msra.mxu2 %v692_v20  ;;  %1008 = vmatpush.msrb.mxu1 %v623_v28  ;;  %v680_v20 = vld [vmem:[#allocation2 + $0x490] sm:$0xff] }
  0x85   : > { %953 = vmatpush.msrb.mxu3 %v601_v27  ;;  %v651_v27 = vld [vmem:[#allocation2 + $0x3a8] sm:$0xff]  ;;  %v568_v28 = vld [vmem:[#allocation2 + $0x110] sm:$0xff] }
  0x86   : > { %986 = vmatpush.msra.mxu2 %v685_v25  ;;  %1009 = vmatpush.msrb.mxu1 %v616_v31  ;;  %v335_v25 = vld [vmem:[%s2331_s0 + $0x78] sm:$0xff]  ;;  %v659_v31 = vld [vmem:[#allocation2 + $0x3e8] sm:$0xff] }
  0x87   : > { %1536 = vmatmul.msk.f32.vlgmr.msra.gmra.mxu1 %vm702_vm0, %v1914_v24  ;;  %1506 = vmatmul.msk.f32.gmra.mxu0 %vm348_vm1, %v330_v26  ;;  %v575_v26 = vld [vmem:[#allocation2 + $0x148] sm:$0xff] }
  0x88   : > { %1533 = vmatmul.msk.f32.gmra.mxu3 %vm702_vm0, %v1929_v39  ;;  %987 = vmatpush.msra.mxu2 %v678_v30  ;;  %v561_v30 = vld [vmem:[#allocation2 + $0xd8] sm:$0xff] }
  0x89   : > { %908 = vmatmul.f32.gmra.mxu2 %v1959_v61  ;;  %954 = vmatpush.msrb.mxu3 %v594_v29  ;;  %v666_v29 = vld [vmem:[#allocation2 + $0x420] sm:$0xff] }
  0x8a   : > { %988 = vmatpush.msra.mxu2 %v671_v33  ;;  %1010 = vmatpush.msrb.mxu1 %v609_v34  ;;  %v554_v33 = vld [vmem:[#allocation2 + $0xa0] sm:$0xff]  ;;  %v652_v34 = vld [vmem:[#allocation2 + $0x3b0] sm:$0xff] }
  0x8b   : > { %955 = vmatpush.msrb.mxu3 %v587_v32 }
  0x8c   : > { %989 = vmatpush.msra.mxu2 %v664_v36  ;;  %1011 = vmatpush.msrb.mxu1 %v602_v38  ;;  %v336_v36 = vld [vmem:[%s2331_s0 + $0x80] sm:$0xff]  ;;  %v540_v38 = vld [vmem:[#allocation2 + $0x30] sm:$0xff] }
  0x8d   : > { %956 = vmatpush.msrb.mxu3 %v580_v35 }
  0x8e   : > { %1012 = vmatpush.msrb.mxu1 %v595_v41  ;;  %990 = vmatpush.msra.mxu2 %v657_v43  ;;  %v337_v43 = vld [vmem:[%s2331_s0 + $0x88] sm:$0xff] }
  0x8f   : > { %1537 = vmatmul.msk.f32.gmra.mxu1 %vm702_vm0, %v1929_v39  ;;  %1507 = vmatmul.msk.f32.gmra.mxu0 %vm348_vm1, %v331_v37  ;;  %v547_v37 = vld [vmem:[#allocation2 + $0x68] sm:$0xff] }
  0x90   : > { %957 = vmatpush.msrb.mxu3 %v573_v40  ;;  %1013 = vmatpush.msrb.mxu1 %v588_v44 }
  0x91   : > { %1534 = vmatmul.msk.f32.gmra.mxu3 %vm702_vm0, %v1945_v51  ;;  %911 = vmatmul.f32.gmra.mxu2 %v1978_v8 }
  0x92   : > { %958 = vmatpush.msrb.mxu3 %v566_v42  ;;  %991 = vmatpush.msra.mxu2 %v650_v46 }
  0x93   : > { %1014 = vmatpush.msrb.mxu1 %v581_v47 }
  0x94   : > { %959 = vmatpush.msrb.mxu3 %v559_v45  ;;  %1063 = vmatpush.msrb.mxu2 %v645_v57 }
  0x95   : > { %1015 = vmatpush.msrb.mxu1 %v574_v52  ;;  %v338_v52 = vld [vmem:[%s2331_s0 + $0x90] sm:$0xff] }
  0x96   : > { %960 = vmatpush.msrb.mxu3 %v552_v48  ;;  %1064 = vmatpush.msrb.mxu2 %v638_v59 }
  0x97   : > { %1538 = vmatmul.msk.f32.gmra.mxu1 %vm702_vm0, %v1945_v51  ;;  %1508 = vmatmul.msk.f32.gmra.mxu0 %vm348_vm1, %v332_v49 }
  0x98   : > { %961 = vmatpush.msrb.mxu3 %v545_v53  ;;  %1016 = vmatpush.msrb.mxu1 %v567_v54 }
  0x99   : > { %1535 = vmatmul.msk.f32.gmra.mxu3 %vm702_vm0, %v1962_v62  ;;  %914 = vmatmul.f32.gmra.mxu2 %v1992_v18 }
  0x9a   : > { %962 = vmatpush.msrb.mxu3 %v538_v55  ;;  %1017 = vmatpush.msrb.mxu1 %v560_v58  ;;  %v339_v58 = vld [vmem:[%s2331_s0 + $0x98] sm:$0xff] }
  0x9b   : > { %1065 = vmatpush.msrb.mxu2 %v631_v2 }
  0x9c   : > { %1042 = vmatpush.msra.mxu3 %v700_v56  ;;  %1018 = vmatpush.msrb.mxu1 %v553_v63 }
  0x9d   : > { %1066 = vmatpush.msrb.mxu2 %v624_v4 }
  0x9e   : > { %1043 = vmatpush.msra.mxu3 %v693_v60  ;;  %1019 = vmatpush.msrb.mxu1 %v546_v1  ;;  %v340_v1 = vld [vmem:[%s2331_s0 + $0xa0] sm:$0xff] }
  0x9f   : > { %1539 = vmatmul.msk.f32.gmra.mxu1 %vm702_vm0, %v1962_v62  ;;  %1509 = vmatmul.msk.f32.gmra.mxu0 %vm348_vm1, %v333_v0 }
  0xa0   : > { %1020 = vmatpush.msrb.mxu1 %v539_v3  ;;  %1044 = vmatpush.msra.mxu3 %v686_v5 }
  0xa1   : > { %963 = vmatmul.f32.vlgmr.msrb.gmra.mxu3 %v1942_v50  ;;  %1540 = vmatmul.msk.f32.vlgmr.msra.gmra.mxu2 %vm702_vm0, %v1914_v24 }
  0xa2   : > { %1100 = vmatpush.msra.mxu1 %v701_v6  ;;  %1067 = vmatpush.msrb.mxu2 %v617_v7 }
  0xa3   : > { %1045 = vmatpush.msra.mxu3 %v679_v9 }
  0xa4   : > { %1101 = vmatpush.msra.mxu1 %v694_v10  ;;  %1068 = vmatpush.msrb.mxu2 %v610_v11 }
  0xa5   : > { %1046 = vmatpush.msra.mxu3 %v672_v14 }
  0xa6   : > { %1069 = vmatpush.msrb.mxu2 %v603_v13  ;;  %1102 = vmatpush.msra.mxu1 %v687_v16 }
  0xa7   : > { %1021 = vmatmul.f32.vlgmr.msrb.gmra.mxu1 %v1942_v50  ;;  %1510 = vmatmul.msk.f32.gmra.mxu0 %vm348_vm1, %v334_v12 }
  0xa8   : > { %1070 = vmatpush.msrb.mxu2 %v596_v15  ;;  %1047 = vmatpush.msra.mxu3 %v665_v17 }
  0xa9   : > { %966 = vmatmul.f32.gmra.mxu3 %v1959_v61  ;;  %1541 = vmatmul.msk.f32.gmra.mxu2 %vm702_vm0, %v1929_v39 }
  0xaa   : > { %1071 = vmatpush.msrb.mxu2 %v589_v19  ;;  %1103 = vmatpush.msra.mxu1 %v680_v20 }
  0xab   : > { %1048 = vmatpush.msra.mxu3 %v658_v21 }
  0xac   : > { %1072 = vmatpush.msrb.mxu2 %v582_v22  ;;  %1104 = vmatpush.msra.mxu1 %v673_v23 }
  0xad   : > { %1049 = vmatpush.msra.mxu3 %v651_v27 }
  0xae   : > { %1073 = vmatpush.msrb.mxu2 %v575_v26  ;;  %v761_v32 = vpop.f32.mrf.mxu2  ;;  %1105 = vmatpush.msra.mxu1 %v666_v29 }
  0xaf   : > { %1024 = vmatmul.f32.gmra.mxu1 %v1959_v61  ;;  %1511 = vmatmul.msk.f32.gmra.mxu0 %vm348_vm1, %v335_v25 }
  0xb0   : > { %1074 = vmatpush.msrb.mxu2 %v568_v28  ;;  %1106 = vmatpush.msra.mxu1 %v659_v31 }
  0xb1   : > { %969 = vmatmul.f32.gmra.mxu3 %v1978_v8  ;;  %1542 = vmatmul.msk.f32.gmra.mxu2 %vm702_vm0, %v1945_v51 }
  0xb2   : > { %1075 = vmatpush.msrb.mxu2 %v561_v30  ;;  %1107 = vmatpush.msra.mxu1 %v652_v34 }
  0xb4   : > { %v450_v35 = vpop.f32.mrf.mxu0  ;;  %1076 = vmatpush.msrb.mxu2 %v554_v33 }
  0xb6   : > { %1077 = vmatpush.msrb.mxu2 %v547_v37 }
  0xb7   : > { %1027 = vmatmul.f32.gmra.mxu1 %v1978_v8  ;;  %1512 = vmatmul.msk.f32.gmra.mxu0 %vm348_vm1, %v336_v36 }
  0xb8   : > { %1078 = vmatpush.msrb.mxu2 %v540_v38  ;;  %v764_v41 = vpop.f32.mrf.mxu2  ;;  %v732_v44 = vpop.f32.mrf.mxu1 }
  0xb9   : > { %972 = vmatmul.f32.gmra.mxu3 %v1992_v18  ;;  %1543 = vmatmul.msk.f32.gmra.mxu2 %vm702_vm0, %v1962_v62  ;;  %v762_v45 = vadd.f32 %v761_v32, %v732_v44 }
  0xba   : > { %v2104_v40 = vpop.f32.mrf.mxu3 }
  0xbb   : > { %v2111_v46 = vadd.f32 %v762_v45, %v450_v35 }
  0xbc   : > { %v453_v42 = vpop.f32.mrf.mxu0 }
  0xbf   : > { %1030 = vmatmul.f32.gmra.mxu1 %v1992_v18  ;;  %1513 = vmatmul.msk.f32.gmra.mxu0 %vm348_vm1, %v337_v43 }
  0xc0   : > { %v767_v48 = vpop.f32.mrf.mxu2 }
  0xc1   : > { %1544 = vmatmul.msk.f32.vlgmr.msra.gmra.mxu3 %vm702_vm0, %v1914_v24  ;;  %1079 = vmatmul.f32.vlgmr.msrb.gmra.mxu2 %v1942_v50  ;;  %v735_v53 = vpop.f32.mrf.mxu1 }
  0xc2   : > { %v2116_v47 = vpop.f32.mrf.mxu3  ;;  %v765_v54 = vadd.f32 %v764_v41, %v735_v53 }
  0xc4   : > { %v456_v49 = vpop.f32.mrf.mxu0  ;;  %v2124_v55 = vadd.f32 %v765_v54, %v453_v42 }
  0xc7   : > { %1548 = vmatmul.msk.f32.vlgmr.msra.gmra.mxu1 %vm702_vm0, %v1914_v24  ;;  %1514 = vmatmul.msk.f32.gmra.mxu0 %vm348_vm1, %v338_v52 }
  0xc8   : > { %v770_v56 = vpop.f32.mrf.mxu2 }
  0xc9   : > { %1545 = vmatmul.msk.f32.gmra.mxu3 %vm702_vm0, %v1929_v39  ;;  %1082 = vmatmul.f32.gmra.mxu2 %v1959_v61  ;;  %v738_v59 = vpop.f32.mrf.mxu1 }
  0xca   : > { %v2129_v50 = vpop.f32.mrf.mxu3  ;;  %v768_v60 = vadd.f32 %v767_v48, %v738_v59 }
  0xcc   : > { %v459_v57 = vpop.f32.mrf.mxu0  ;;  %v2137_v24 = vadd.f32 %v768_v60, %v456_v49 }
  0xcf   : > { %1549 = vmatmul.msk.f32.gmra.mxu1 %vm702_vm0, %v1929_v39  ;;  %1515 = vmatmul.msk.f32.gmra.mxu0 %vm348_vm1, %v339_v58 }
  0xd1   : > { %1546 = vmatmul.msk.f32.gmra.mxu3 %vm702_vm0, %v1945_v51  ;;  %1085 = vmatmul.f32.gmra.mxu2 %v1978_v8  ;;  %v741_v2 = vpop.f32.mrf.mxu1 }
  0xd2   : > { %v2142_v61 = vpop.f32.mrf.mxu3  ;;  %v771_v3 = vadd.f32 %v770_v56, %v741_v2 }
  0xd3   : > { %v790_v63 = vpop.f32.mrf.mxu2 }
  0xd4   : > { %v462_v0 = vpop.f32.mrf.mxu0  ;;  %v2150_v39 = vadd.f32 %v771_v3, %v459_v57 }
  0xd7   : > { %1550 = vmatmul.msk.f32.gmra.mxu1 %vm702_vm0, %v1945_v51  ;;  %1516 = vmatmul.msk.f32.gmra.mxu0 %vm348_vm1, %v340_v1 }
  0xd9   : > { %1547 = vmatmul.msk.f32.gmra.mxu3 %vm702_vm0, %v1962_v62  ;;  %1088 = vmatmul.f32.gmra.mxu2 %v1992_v18 }
  0xdb   : > { %v2155_v8 = vpop.f32.mrf.mxu3  ;;  %v793_v4 = vpop.f32.mrf.mxu2 }
  0xdc   : > { %v465_v5 = vpop.f32.mrf.mxu0 }
  0xdf   : > { %1551 = vmatmul.msk.f32.gmra.mxu1 %vm702_vm0, %v1962_v62 }
  0xe3   : > { %v2159_v6 = vpop.f32.mrf.mxu3  ;;  %v819_v7 = vpop.f32.mrf.mxu2 }
  0xe4   : > { %v820_v51 = vadd.f32 %v819_v7, %v790_v63  ;;  %v848_v9 = vpop.f32.mrf.mxu1  ;;  %v468_v10 = vpop.f32.mrf.mxu0 }
  0xe6   : > { %v1125_v11 = vadd.f32 %v820_v51, %v462_v0 }
  0xe8   : > { %v1129_v12 = vmax.f32 %v2111_v46, %v1125_v11 }
  0xeb   : > { %v2162_v13 = vpop.f32.mrf.mxu3 }
  0xec   : > { %v822_v14 = vpop.f32.mrf.mxu2  ;;  %v851_v15 = vpop.f32.mrf.mxu1 }
  0xed   : > { %v823_v18 = vadd.f32 %v822_v14, %v793_v4  ;;  %v471_v16 = vpop.f32.mrf.mxu0 }
  0xef   : > { %v1126_v17 = vadd.f32 %v823_v18, %v465_v5 }
  0xf1   : > { %v1130_v19 = vmax.f32 %v2124_v55, %v1126_v17 }
  0xf3   : > { %v796_v20 = vpop.f32.mrf.mxu3 }
  0xf4   : > { %v825_v62 = vpop.f32.mrf.mxu2  ;;  %v854_v22 = vpop.f32.mrf.mxu1 }
  0xf5   : > { %v826_v21 = vadd.f32 %v825_v62, %v796_v20  ;;  %v474_v23 = vpop.f32.mrf.mxu0 }
  0xf7   : > { %v1127_v25 = vadd.f32 %v826_v21, %v468_v10 }
  0xf9   : > { %v1131_v26 = vmax.f32 %v2137_v24, %v1127_v25 }
  0xfb   : > { %v799_v27 = vpop.f32.mrf.mxu3 }
  0xfc   : > { %v828_v28 = vpop.f32.mrf.mxu2  ;;  %v857_v30 = vpop.f32.mrf.mxu1 }
  0xfd   : > { %v829_v29 = vadd.f32 %v828_v28, %v799_v27  ;;  %v477_v31 = vpop.f32.mrf.mxu0 }
  0xff   : > { %v1128_v32 = vadd.f32 %v829_v29, %v471_v16 }
 0x101   : > { %v1132_v33 = vmax.f32 %v2150_v39, %v1128_v32 }
 0x103   : > { %v877_v34 = vpop.f32.mrf.mxu3 }
 0x104   : > { %v906_v35 = vpop.f32.mrf.mxu2  ;;  %v878_v36 = vadd.f32 %v877_v34, %v848_v9  ;;  %v935_v37 = vpop.f32.mrf.mxu1 }
 0x105   : > { %v480_v38 = vpop.f32.mrf.mxu0  ;;  %v936_v41 = vadd.f32 %v935_v37, %v906_v35 }
 0x106   : > { %v1133_v42 = vadd.f32 %v878_v36, %v474_v23 }
 0x108   : > { %v2167_v43 = vmax.f32 %v1129_v12, %v1133_v42 }
 0x10b   : > { %v880_v44 = vpop.f32.mrf.mxu3 }
 0x10c   : > { %v909_v45 = vpop.f32.mrf.mxu2  ;;  %v881_v46 = vadd.f32 %v880_v44, %v851_v15  ;;  %v938_v48 = vpop.f32.mrf.mxu1 }
 0x10d   : > { %v483_v49 = vpop.f32.mrf.mxu0  ;;  %v939_v28 = vadd.f32 %v938_v48, %v909_v45 }
 0x10e   : > { %v1134_v52 = vadd.f32 %v881_v46, %v477_v31 }
 0x110   : > { %v1138_v53 = vmax.f32 %v1130_v19, %v1134_v52 }
 0x114   : > { %v883_v54 = vpop.f32.mrf.mxu3  ;;  %v912_v55 = vpop.f32.mrf.mxu2 }
 0x115   : > { %v884_v56 = vadd.f32 %v883_v54, %v854_v22  ;;  %v941_v57 = vpop.f32.mrf.mxu1  ;;  %v486_v58 = vpop.f32.mrf.mxu0 }
 0x116   : > { %v2169_v59 = vadd.f32 %v936_v41, %v486_v58  ;;  %v942_v41 = vadd.f32 %v941_v57, %v912_v55 }
 0x117   : > { %v1135_v60 = vadd.f32 %v884_v56, %v480_v38 }
 0x118   : > { %v1145_v24 = vmax.f32 %v2167_v43, %v2169_v59 }
 0x119   : > { %v2173_v63 = vmax.f32 %v1131_v26, %v1135_v60 }
 0x11c   : > { %v886_v0 = vpop.f32.mrf.mxu3  ;;  %v915_v1 = vpop.f32.mrf.mxu2 }
 0x11d   : > { %v887_v2 = vadd.f32 %v886_v0, %v857_v30  ;;  %v944_v3 = vpop.f32.mrf.mxu1  ;;  %v489_v39 = vpop.f32.mrf.mxu0 }
 0x11e   : > { %v1142_v29 = vadd.f32 %v939_v28, %v489_v39 }
 0x11f   : > { %v1136_v4 = vadd.f32 %v887_v2, %v483_v49 }
 0x120   : > { %v1146_v34 = vmax.f32 %v1138_v53, %v1142_v29 }
 0x121   : > { %v2175_v5 = vmax.f32 %v1132_v33, %v1136_v4 }
 0x124   : > { %v964_v7 = vpop.f32.mrf.mxu3  ;;  %v993_v51 = vpop.f32.mrf.mxu2 }
 0x125   : > { %v1022_v9 = vpop.f32.mrf.mxu1  ;;  %v492_v10 = vpop.f32.mrf.mxu0  ;;  %v994_v46 = vadd.f32 %v993_v51, %v964_v7  ;;  %v1181_v7 = vlaneseq  ;;  %v945_v51 = vadd.f32 %v944_v3, %v915_v1 }
 0x126   : > { %v1143_v49 = vadd.f32 %v942_v41, %v492_v10 }
 0x127   : > { %v2198_v59 = vshrl.u32 %v1181_v7, 7 }
 0x128   : > { %v1147_v39 = vmax.f32 %v2173_v63, %v1143_v49 }
 0x129   : > { %vm1183_vm2 = vcmp.lt.s32.totalorder %v2198_v59, 7  ;;  %vm1196_vm3 = vcmp.lt.s32.totalorder %v2198_v59, 6  ;;  %vm1209_vm4 = vcmp.lt.s32.totalorder %v2198_v59, 4  ;;  %vm1222_vm5 = vcmp.lt.s32.totalorder %v2198_v59, 5 }
 0x12c   : > { %v967_v11 = vpop.f32.mrf.mxu3  ;;  %v996_v12 = vpop.f32.mrf.mxu2 }
 0x12d   : > { %v1025_v14 = vpop.f32.mrf.mxu1  ;;  %v495_v18 = vpop.f32.mrf.mxu0  ;;  %v997_v30 = vadd.f32 %v996_v12, %v967_v11 }
 0x134   : > { %v970_v15 = vpop.f32.mrf.mxu3  ;;  %v999_v16 = vpop.f32.mrf.mxu2 }
 0x135   : > { %v1028_v17 = vpop.f32.mrf.mxu1  ;;  %v498_v19 = vpop.f32.mrf.mxu0  ;;  %v1000_v45 = vadd.f32 %v999_v16, %v970_v15 }
 0x136   : > { %v1149_v54 = vadd.f32 %v994_v46, %v498_v19 }
 0x13c   : > { %v973_v20 = vpop.f32.mrf.mxu3  ;;  %v1002_v62 = vpop.f32.mrf.mxu2 }
 0x13d   : > { %v2177_v21 = vpop.f32.mrf.mxu1  ;;  %v501_v22 = vpop.f32.mrf.mxu0  ;;  %v1003_v16 = vadd.f32 %v1002_v62, %v973_v20 }
 0x13e   : > { %v1150_v31 = vadd.f32 %v997_v30, %v501_v22 }
 0x140   : > { %v1154_v42 = vmax.f32 %v1146_v34, %v1150_v31 }
 0x144   : > { %v1051_v23 = vpop.f32.mrf.mxu3  ;;  %v1080_v25 = vpop.f32.mrf.mxu2 }
 0x145   : > { %v1109_v26 = vpop.f32.mrf.mxu1  ;;  %v504_v27 = vpop.f32.mrf.mxu0  ;;  %v1052_v58 = vadd.f32 %v1051_v23, %v1022_v9  ;;  %v1144_v9 = vadd.f32 %v945_v51, %v495_v18 }
 0x146   : > { %v1151_v53 = vadd.f32 %v1000_v45, %v504_v27  ;;  %v1110_v60 = vadd.f32 %v1109_v26, %v1080_v25 }
 0x148   : > { %v1155_v12 = vmax.f32 %v1147_v39, %v1151_v53 }
 0x14c   : > { %v1054_v32 = vpop.f32.mrf.mxu3  ;;  %v1083_v33 = vpop.f32.mrf.mxu2 }
 0x14d   : > { %v1055_v35 = vadd.f32 %v1054_v32, %v1025_v14  ;;  %v1112_v36 = vpop.f32.mrf.mxu1  ;;  %v507_v37 = vpop.f32.mrf.mxu0  ;;  %v1165_v14 = vadd.f32 %v1110_v60, %v2142_v61 }
 0x14e   : > { %v1113_v38 = vadd.f32 %v1112_v36, %v1083_v33  ;;  %v1152_v3 = vadd.f32 %v1003_v16, %v507_v37 }
 0x14f   : > { %v1158_v44 = vadd.f32 %v1055_v35, %v2104_v40 }
 0x150   : > { %v1166_v52 = vadd.f32 %v1113_v38, %v2155_v8  ;;  %v1153_v8 = vmax.f32 %v1145_v24, %v1149_v54 }
 0x151   : > { %v1162_v48 = vmax.f32 %v1154_v42, %v1158_v44 }
 0x153   : > { %v1170_v56 = vmax.f32 %v1162_v48, %v1166_v52 }
 0x154   : > { %v1057_v0 = vpop.f32.mrf.mxu3  ;;  %v1086_v2 = vpop.f32.mrf.mxu2 }
 0x155   : > { %v2186_v55 = vmax.f32 %v1170_v56, 0.0  ;;  %v1058_v57 = vadd.f32 %v1057_v0, %v1028_v17  ;;  %v1115_v40 = vpop.f32.mrf.mxu1  ;;  %v510_v4 = vpop.f32.mrf.mxu0 }
 0x156   : > { %v1116_v10 = vadd.f32 %v1115_v40, %v1086_v2  ;;  %v1157_v11 = vadd.f32 %v1052_v58, %v510_v4 }
 0x157   : > { %1320 = vst [vmem:[%s2191_s29 + $0x8] sm:$0xff] %v2186_v55  ;;  %v1159_v63 = vadd.f32 %v1058_v57, %v2116_v47  ;;  %v1148_v47 = vmax.f32 %v2175_v5, %v1144_v9  ;;  %v1178_v25 = vrot.slane %v2186_v55, 1 }
 0x158   : > { %v1161_v15 = vmax.f32 %v1153_v8, %v1157_v11  ;;  %v1167_v43 = vadd.f32 %v1116_v10, %v2159_v6 }
 0x159   : > { %v1163_v1 = vmax.f32 %v1155_v12, %v1159_v63  ;;  %v1156_v26 = vmax.f32 %v1148_v47, %v1152_v3 }
 0x15a   : > { %v1169_v24 = vmax.f32 %v1161_v15, %v1165_v14 }
 0x15b   : > { %v1171_v17 = vmax.f32 %v1163_v1, %v1167_v43 }
 0x15c   : > { %v2200_v19 = vmax.f32 %v1169_v24, 0.0  ;;  %v1060_v22 = vpop.f32.mrf.mxu3  ;;  %v1089_v23 = vpop.f32.mrf.mxu2 }
 0x15d   : > { %v2203_v18 = vmax.f32 %v1171_v17, 0.0  ;;  %v1061_v61 = vadd.f32 %v1060_v22, %v2177_v21  ;;  %v1118_v20 = vpop.f32.mrf.mxu1 }
 0x15e   : > { %v1177_v6 = vrot.slane %v2200_v19, 1  ;;  %1319 = vst [vmem:[%s2191_s29] sm:$0xff] %v2200_v19  ;;  %v1119_v62 = vadd.f32 %v1118_v20, %v1089_v23 }
 0x15f   : > { %1321 = vst [vmem:[%s2191_s29 + $0x10] sm:$0xff] %v2203_v18  ;;  %v1160_v5 = vadd.f32 %v1061_v61, %v2129_v50  ;;  %v1179_v27 = vrot.slane %v2203_v18, 1 }
 0x160   : > { %v1186_v21 = vsel %vm1183_vm2, %v1177_v6, %v1178_v25  ;;  %v1168_v29 = vadd.f32 %v1119_v62, %v2162_v13 }
 0x161   : > { %v1164_v28 = vmax.f32 %v1156_v26, %v1160_v5  ;;  %v1185_v30 = vsel %vm1183_vm2, %v1178_v25, %v1179_v27  ;;  %v1188_v31 = vmax.f32 %v2200_v19, %v1186_v21 }
 0x162   : > { %v1189_v32 = vmax.f32 %v2186_v55, %v1185_v30 }
 0x163   : > { %v1172_v33 = vmax.f32 %v1164_v28, %v1168_v29  ;;  %v1192_v35 = vrot.slane %v1188_v31, 2 }
 0x164   : > { %v1193_v50 = vrot.slane %v1189_v32, 2 }
 0x165   : > { %v2222_v34 = vmax.f32 %v1172_v33, 0.0 }
 0x166   : > { %v1199_v42 = vsel %vm1196_vm3, %v1192_v35, %v1193_v50 }
 0x167   : > { %1322 = vst [vmem:[%s2191_s29 + $0x18] sm:$0xff] %v2222_v34  ;;  %v1180_v36 = vrot.slane %v2222_v34, 1  ;;  %v1201_v49 = vmax.f32 %v1188_v31, %v1199_v42 }
 0x169   : > { %v1184_v13 = vsel %vm1183_vm2, %v1179_v27, %v1180_v36  ;;  %v1187_v37 = vsel %vm1183_vm2, %v1180_v36, %v1177_v6  ;;  %v1205_v58 = vrot.slane %v1201_v49, 4 }
 0x16a   : > { %v1190_v38 = vmax.f32 %v2203_v18, %v1184_v13  ;;  %v1191_v41 = vmax.f32 %v2222_v34, %v1187_v37 }
 0x16c   : > { %v1194_v44 = vrot.slane %v1190_v38, 2  ;;  %v1195_v46 = vrot.slane %v1191_v41, 2 }
 0x16e   : > { %v1197_v45 = vsel %vm1196_vm3, %v1194_v44, %v1195_v46  ;;  %v1198_v48 = vsel %vm1196_vm3, %v1193_v50, %v1194_v44  ;;  %v1200_v52 = vsel %vm1196_vm3, %v1195_v46, %v1192_v35 }
 0x16f   : > { %v1202_v54 = vmax.f32 %v1189_v32, %v1198_v48  ;;  %v1203_v53 = vmax.f32 %v1190_v38, %v1197_v45  ;;  %v1204_v56 = vmax.f32 %v1191_v41, %v1200_v52 }
 0x171   : > { %v1206_v60 = vrot.slane %v1202_v54, 4  ;;  %v1207_v0 = vrot.slane %v1203_v53, 4  ;;  %v1208_v2 = vrot.slane %v1204_v56, 4 }
 0x173   : > { %v1210_v39 = vsel %vm1209_vm4, %v1207_v0, %v1208_v2  ;;  %v1211_v57 = vsel %vm1209_vm4, %v1206_v60, %v1207_v0  ;;  %v1213_v40 = vsel %vm1209_vm4, %v1208_v2, %v1205_v58  ;;  %v1212_v4 = vsel %vm1209_vm4, %v1205_v58, %v1206_v60 }
 0x174   : > { %v1215_v7 = vmax.f32 %v1202_v54, %v1211_v57  ;;  %v1216_v51 = vmax.f32 %v1203_v53, %v1210_v39  ;;  %v1217_v8 = vmax.f32 %v1204_v56, %v1213_v40  ;;  %v1214_v10 = vmax.f32 %v1201_v49, %v1212_v4 }
 0x176   : > { %v1219_v11 = vrot.slane %v1215_v7, 3  ;;  %v1220_v12 = vrot.slane %v1216_v51, 3  ;;  %v1221_v63 = vrot.slane %v1217_v8, 3  ;;  %v1218_v9 = vrot.slane %v1214_v10, 3 }
 0x178   : > { %v1223_v14 = vsel %vm1222_vm5, %v1220_v12, %v1221_v63  ;;  %v1224_v15 = vsel %vm1222_vm5, %v1219_v11, %v1220_v12  ;;  %v1225_v16 = vsel %vm1222_vm5, %v1218_v9, %v1219_v11  ;;  %v1226_v1 = vsel %vm1222_vm5, %v1221_v63, %v1218_v9 }
 0x179   : > { %v1228_v43 = vmax.f32 %v1215_v7, %v1224_v15  ;;  %v1229_v24 = vmax.f32 %v1216_v51, %v1223_v14  ;;  %v1227_v3 = vmax.f32 %v1214_v10, %v1225_v16  ;;  %v1230_v17 = vmax.f32 %v1217_v8, %v1226_v1 }
 0x17b   : > { %v1232_v22 = vrot.slane %v1228_v43, 3  ;;  %v1233_v23 = vrot.slane %v1229_v24, 3  ;;  %v1231_v47 = vrot.slane %v1227_v3, 3  ;;  %v1234_v61 = vrot.slane %v1230_v17, 3 }
 0x17d   : > { %v1236_v20 = vsel %vm1222_vm5, %v1232_v22, %v1233_v23  ;;  %v1238_v6 = vsel %vm1222_vm5, %v1234_v61, %v1231_v47  ;;  %v1235_v62 = vsel %vm1222_vm5, %v1233_v23, %v1234_v61  ;;  %v1237_v25 = vsel %vm1222_vm5, %v1231_v47, %v1232_v22 }
 0x17e   : > { %1243 = vrot.lane.b32.xlu1 %v1236_v20, %s1788_s10  ;;  %1239 = vrot.lane.b32.xlu0 %v1238_v6, %s1788_s10 }
 0x186   : > { %1245 = vrot.lane.b32.xlu1 %v1235_v62, %s1788_s10  ;;  %1241 = vrot.lane.b32.xlu0 %v1237_v25, %s1788_s10  ;;  %s1701_s10 = scalar_lea.hbm %s1700_s28, 32 }
 0x187   : > { %p1702_p0 = scmp.ne.s32.totalorder %s1700_s28, %s1701_s10 }
 0x189   : > { %p1703_p1 = pnand %p1702_p0, %p1869_p5 }
 0x18b   : > { %p1704_p2 = pneg %p1703_p1 }
 0x1f0   : > { %v1244_v26 = vpop.permute.xlu1 %1243  ;;  %v1240_v5 = vpop.permute.xlu0 %1239 }
 0x1f1   : > { %v1249_v27 = vmax.f32 %v1236_v20, %v1244_v26  ;;  %v1247_v21 = vmax.f32 %v1238_v6, %v1240_v5 }
 0x1f3   : > { %1251 = vrot.lane.b32.xlu2 %v1247_v21, %s1789_s11  ;;  %1255 = vrot.lane.b32.xlu0 %v1249_v27, %s1789_s11 }
 0x1f8   : > { %v1246_v28 = vpop.permute.xlu1 %1245  ;;  %v1242_v29 = vpop.permute.xlu0 %1241 }
 0x1f9   : > { %v1250_v30 = vmax.f32 %v1235_v62, %v1246_v28  ;;  %v1248_v31 = vmax.f32 %v1237_v25, %v1242_v29 }
 0x1fb   : > { %1257 = vrot.lane.b32.xlu1 %v1250_v30, %s1789_s11  ;;  %1253 = vrot.lane.b32.xlu2 %v1248_v31, %s1789_s11 }
 0x24d   : > { %v1252_v32 = vpop.permute.xlu2 %1251 }
 0x24e   : > { %v1259_v33 = vmax.f32 %v1247_v21, %v1252_v32 }
 0x250   : > { %1263 = vrot.lane.b32.xlu2 %v1259_v33, %s1790_s12 }
 0x255   : > { %v1254_v59 = vpop.permute.xlu2 %1253 }
 0x256   : > { %v1260_v35 = vmax.f32 %v1248_v31, %v1254_v59 }
 0x258   : > { %1265 = vrot.lane.b32.xlu0 %v1260_v35, %s1790_s12 }
 0x265   : > { %v1256_v50 = vpop.permute.xlu0 %1255 }
 0x266   : > { %v1261_v36 = vmax.f32 %v1249_v27, %v1256_v50 }
 0x268   : > { %1267 = vrot.lane.b32.xlu1 %v1261_v36, %s1790_s12 }
 0x26d   : > { %v1258_v13 = vpop.permute.xlu1 %1257 }
 0x26e   : > { %v1262_v37 = vmax.f32 %v1250_v30, %v1258_v13 }
 0x270   : > { %1269 = vrot.lane.b32.xlu2 %v1262_v37, %s1790_s12 }
 0x2aa   : > { %v1264_v38 = vpop.permute.xlu2 %1263 }
 0x2ab   : > { %v1271_v41 = vmax.f32 %v1259_v33, %v1264_v38 }
 0x2ad   : > { %1275 = vrot.lane.b32.xlu0 %v1271_v41, %s1791_s13 }
 0x2ca   : > { %v1270_v42 = vpop.permute.xlu2 %1269  ;;  %v1266_v44 = vpop.permute.xlu0 %1265 }
 0x2cb   : > { %v1274_v46 = vmax.f32 %v1262_v37, %v1270_v42  ;;  %v1272_v49 = vmax.f32 %v1260_v35, %v1266_v44 }
 0x2cd   : > { %1281 = vrot.lane.b32.xlu0 %v1274_v46, %s1791_s13  ;;  %1277 = vrot.lane.b32.xlu1 %v1272_v49, %s1791_s13 }
 0x2da   : > { %v1268_v45 = vpop.permute.xlu1 %1267 }
 0x2db   : > { %v1273_v48 = vmax.f32 %v1261_v36, %v1268_v45 }
 0x2dd   : > { %1279 = vrot.lane.b32.xlu2 %v1273_v48, %s1791_s13  ;;  %s1705_s13 = scalar_lea.hbm %s2336_s5, 64 }
 0x2de   : > { %p1707_p4 = scmp.lt.s32.totalorder %s1705_s13, %s1701_s10 }
 0x2e0   : > { %p1708_p7 = por %p1707_p4, %p1706_p3 }
 0x2e2   : > { %p1709_p8 = pnand %p1708_p7, %p1704_p2 }
 0x31f   : > { %v1276_v52 = vpop.permute.xlu0 %1275 }
 0x320   : > { %v1283_v54 = vmax.f32 %v1271_v41, %v1276_v52 }
 0x322   : > { %1287 = vrot.lane.b32.xlu1 %v1283_v54, %s1792_s14 }
 0x337   : > { %v1280_v53 = vpop.permute.xlu2 %1279 }
 0x338   : > { %v1285_v56 = vmax.f32 %v1273_v48, %v1280_v53 }
 0x33a   : > { %1291 = vrot.lane.b32.xlu0 %v1285_v56, %s1792_s14 }
 0x33f   : > { %v1278_v58 = vpop.permute.xlu1 %1277  ;;  %v1282_v60 = vpop.permute.xlu0 %1281 }
 0x340   : > { %v1284_v0 = vmax.f32 %v1272_v49, %v1278_v58  ;;  %v1286_v2 = vmax.f32 %v1274_v46, %v1282_v60 }
 0x341   : > { %1712 = shalt.err (!%p1709_p8)
}
 0x342   : > { %s1793_s9 = smov 128   ;;  %s1794_s16 = smov 8   ;;  %1289 = vrot.lane.b32.xlu2 %v1284_v0, %s1792_s14  ;;  %1293 = vrot.lane.b32.xlu1 %v1286_v2, %s1792_s14  ;;  %v1308_v40 = vld [vmem:[%s2333_s2 + $0x8] sm:$0xff]  ;;  %v1307_v7 = vld [vmem:[%s2333_s2] sm:$0xff]  ;;  %vm1300_vm8 = vcmp.gt.f32.partialorder %v2186_v55, 0.5  ;;  %vm1299_vm11 = vcmp.gt.f32.partialorder %v2200_v19, 0.5 }
 0x343   : > { %1594 = dma.vmem_to_hbm [thread:$0]  (%p1869_p5), %s1350_s18, 512, %s1352_s19, %s1332_s20, %s1793_s9, %s1793_s9, %s1794_s16   ;;  %vm1312_vm9 = vcmp.gt.f32.partialorder %v1308_v40, 0.5  ;;  %vm1311_vm13 = vcmp.gt.f32.partialorder %v1307_v7, 0.5  ;;  %vm1301_vm0 = vcmp.gt.f32.partialorder %v2203_v18, 0.5 }
 0x344   : > { %v1309_v51 = vld [vmem:[%s2333_s2 + $0x10] sm:$0xff]  ;;  %s1492_s12 = sshll.u32 %s2180_s26, 3  ;;  %s1556_s13 = sshll.u32 %s1852_s25, 3 }
 0x345   : > { %vm1313_vm1 = vcmp.gt.f32.partialorder %v1309_v51, 0.5  ;;  %s1364_s9 = scalar_lea.hbm %s2337_s6, %s1556_s13  ;;  %s287_s25 = scalar_lea.vmem [#allocation6], %s1492_s12 }
 0x346   : > { %s1366_s16 = sshll.u32 %s287_s25, 4  ;;  %s1368_s17 = sshll.u32 %s1364_s9, 4  ;;  %s1367_s16 = int_to_ptr.vmem [resolvable:$true] %s1366_s16  ;;  %s1369_s17 = int_to_ptr.hbm [resolvable:$true] %s1368_s17 }
 0x347   : > { %s1337_s11 = scalar_lea.sflag [#allocation7], %s2180_s26  ;;  %s1727_s28 = sshra.s32 %s1369_s17, 4  ;;  %s1728_s28 = int_to_ptr.hbm [resolvable:$true] %s1727_s28 }
 0x348   : > { %s1729_s10 = scalar_lea.hbm %s1728_s28, 8  ;;  %s1733_s19 = scalar_lea.hbm %s2337_s6, 16 }
 0x349   : > { %p1730_p9 = scmp.ne.s32.totalorder %s1728_s28, %s1729_s10  ;;  %p1734_p12 = scmp.lt.s32.totalorder %s1728_s28, %s2337_s6 }
 0x34a   : > { %p1735_p13 = scmp.lt.s32.totalorder %s1733_s19, %s1729_s10 }
 0x34b   : > { %p1731_p10 = pnand %p1730_p9, %p1869_p5 }
 0x34c   : > { %p1736_p0 = por %p1735_p13, %p1734_p12 }
 0x34d   : > { %p1732_p11 = pneg %p1731_p10 }
 0x34f   : > { %p1737_p1 = pnand %p1736_p0, %p1732_p11 }
 0x394   : > { %v1288_v57 = vpop.permute.xlu1 %1287 }
 0x395   : > { %vm1295_vm7 = vcmp.eq.f32.partialorder %v2200_v19, %v1288_v57 }
 0x396   : > { %vm1303_vm14 = vmand %vm1295_vm7, %vm1299_vm11  ;;  %vm1302_vm7 = vcmp.gt.f32.partialorder %v2222_v34, 0.5 }
 0x397   : > { %vm1315_vm3 = vmand %vm1303_vm14, %vm1311_vm13 }
 0x39c   : > { %v1290_v39 = vpop.permute.xlu2 %1289 }
 0x39d   : > { %vm1296_vm6 = vcmp.eq.f32.partialorder %v2186_v55, %v1290_v39  ;;  %v1310_v55 = vld [vmem:[%s2333_s2 + $0x18] sm:$0xff] }
 0x39e   : > { %vm1304_vm10 = vmand %vm1296_vm6, %vm1300_vm8  ;;  %vm1314_vm5 = vcmp.gt.f32.partialorder %v1310_v55, 0.5 }
 0x39f   : > { %vm2286_vm15 = vmand %vm1304_vm10, %vm1312_vm9 }
 0x3a0   : > { %vm1323_vm4 = vmpackc.low %vm2286_vm15, %vm1315_vm3 }
 0x3ac   : > { %v1292_v4 = vpop.permute.xlu0 %1291 }
 0x3ad   : > { %vm1297_vm12 = vcmp.eq.f32.partialorder %v2203_v18, %v1292_v4  ;;  %v1795_v18 = vmov 0  }
 0x3ae   : > { %vm1305_vm2 = vmand %vm1297_vm12, %vm1301_vm0  ;;  %v1325_v10 = vsel %vm1323_vm4, 16711935, %v1795_v18 }
 0x3af   : > { %vm1317_vm6 = vmand %vm1305_vm2, %vm1313_vm1 }
 0x3b4   : > { %v1294_v19 = vpop.permute.xlu1 %1293 }
 0x3b5   : > { %vm1298_vm8 = vcmp.eq.f32.partialorder %v2222_v34, %v1294_v19 }
 0x3b6   : > { %vm1306_vm9 = vmand %vm1298_vm8, %vm1302_vm7 }
 0x3b7   : > { %vm1318_vm10 = vmand %vm1306_vm9, %vm1314_vm5 }
 0x3b8   : > { %vm1324_vm11 = vmpackc.low %vm1318_vm10, %vm1317_vm6 }
 0x3b9   : > { %v1326_v11 = vsel %vm1324_vm11, 16711935, %v1795_v18 }
 0x3ba   : > { %v1327_v12 = vpack.c.b8 %v1326_v11, %v1325_v10 }
 0x3bc   : > { %vm1328_vm12 = vnez %v1327_v12 }
 0x3bd   : > { %v1329_v34 = vsel %vm1328_vm12, 16843009, %v1795_v18 }
 0x3be   : > { %1330 = vst [vmem:[%s287_s25] sm:$0xff] %v1329_v34 }
 0x3bf   : > { %1740 = shalt.err (!%p1737_p1)
}
 0x3c0   : > { %1595 = dma.vmem_to_hbm [thread:$0]  (%p1869_p5), %s1367_s16, 128, %s1369_s17, %s1337_s11  }
 0x3c1 PF: > { %p1611_p2 = scmp.ge.s32.totalorder %s1783_s24, 2  ;;  %s1380_s26 = sand.u32 1, %s1771_s21  }
 0x3c2   : > { %s1381_s13 = scalar_lea.sflag [#allocation4], %s1380_s26 }
 0x3c3   : > { %p1603_p3 = pnand %p1611_p2, %p1873_p6 }
 0x3c5   : > { %p1604_p4 = pneg %p1603_p3 }
 0x3c7   : > { %1762 = dma.done.wait (%p1604_p4), %s1381_s13, 512  }
 0x3c8   : > { %1764 = vsyncadd (%p1604_p4), %s1381_s13, 4294966784  ;;  %s1391_s29 = scalar_lea.sflag [#allocation7], %s1380_s26 }
 0x3c9   : > { %1766 = dma.done.wait (%p1604_p4), %s1391_s29, 128  }
 0x3ca   : > { %1768 = vsyncadd (%p1604_p4), %s1391_s29, 4294967168  ;;  %p21_p5 = scmp.ge.s32.totalorder %s1856_s27, 4   ;;  %s2342_s21 = smov %s1775_s22 }
 0x3cb   : > { %s2343_s22 = smov %s1779_s23  ;;  %s2344_s23 = smov %s1867_s30 }
 0x3cc   : > { %s2345_s24 = smov %s1856_s27  ;;  %23 = sbr.rel (!%p21_p5) target bundleno = 6 (0x6), region = 100 }
 0x3d1   :  { %1397 = vsyncpa [#allocation3], 1 }
 0x3d2   :  { %1399 = vsyncpa [#allocation3 + $0x1], 1 }
 0x3d3   :  { %1400 = vsyncpa [#allocation4], 1 }
 0x3d4   :  { %1402 = vsyncpa [#allocation4 + $0x1], 1 }
 0x3d5   :  { %1403 = vsyncpa [#allocation7], 1 }
 0x3d6   :  { %1405 = vsyncpa [#allocation7 + $0x1], 1 }

</bundles_post_ra>
